<compile_context>
chip_gen: v5e
topology: v5e:2x2
jax: 0.10.0
libtpu: 0.0.40
codegen_flags: <defaults>
</compile_context>

<pallas_src>
import functools

import jax
import jax.numpy as jnp
from jax.experimental import pallas as pl
from jax.experimental.pallas import tpu as pltpu


def _qnet_lstm_kernel(
    s_ref, a_ref, la_ref, h0_ref, c0_ref,
    w1s_ref, w1a_ref, b1_ref,
    w2s_ref, w2la_ref, b2_ref,
    wih_ref, whh_ref, bg_ref,
    w3fc_ref, w3lstm_ref, b3_ref,
    w4_ref, b4_ref,
    q_ref, hn_ref, cn_ref,
    l3_s,
    *, seq_len, batch, hidden_dim,
):
    T, B, H = seq_len, batch, hidden_dim
    f32 = jnp.float32

    # ---------------- Phase 1: hoisted batched matmuls (all T*B rows) --------
    s = s_ref[...]                                                   # (T*B, S)
    fc = jnp.maximum(
        jnp.dot(s, w1s_ref[...], preferred_element_type=f32)
        + jnp.dot(a_ref[...], w1a_ref[...], preferred_element_type=f32)
        + b1_ref[...], 0.0)                                          # (T*B, H)
    z2 = jnp.maximum(
        jnp.dot(s, w2s_ref[...], preferred_element_type=f32)
        + jnp.dot(la_ref[...], w2la_ref[...], preferred_element_type=f32)
        + b2_ref[...], 0.0)                                          # (T*B, H)

    # Gate-major input-side projections for ALL timesteps (both LSTM biases
    # folded).  One (T*B, H) value per gate -> no lane slicing in the loop.
    gx = [
        jnp.dot(z2, wih_ref[g], preferred_element_type=f32) + bg_ref[g]
        for g in range(4)
    ]                                                                # 4 x (T*B, H)

    # ---------------- Phase 2: sequential LSTM recurrence --------------------
    whh_i = whh_ref[0]
    whh_f = whh_ref[1]
    whh_g = whh_ref[2]
    whh_o = whh_ref[3]
    w3l = w3lstm_ref[...]                                            # (H, H)

    h = h0_ref[...]                                                  # (B, H)
    c = c0_ref[...]                                                  # (B, H)

    # Static, fully-unrolled time loop (T is small).  For long sequences,
    # switch to lax.fori_loop with a bounded unroll factor.
    for t in range(T):
        r0, r1 = t * B, (t + 1) * B
        pre_i = gx[0][r0:r1, :] + jnp.dot(h, whh_i, preferred_element_type=f32)
        pre_f = gx[1][r0:r1, :] + jnp.dot(h, whh_f, preferred_element_type=f32)
        pre_g = gx[2][r0:r1, :] + jnp.dot(h, whh_g, preferred_element_type=f32)
        pre_o = gx[3][r0:r1, :] + jnp.dot(h, whh_o, preferred_element_type=f32)
        i_g = jax.nn.sigmoid(pre_i)
        f_g = jax.nn.sigmoid(pre_f)
        g_g = jnp.tanh(pre_g)
        o_g = jax.nn.sigmoid(pre_o)
        c = f_g * c + i_g * g_g
        h = o_g * jnp.tanh(c)
        # W3_lstm contribution for this timestep: off the h_{t+1} critical
        # path, so it executes in the recurrence's MXU latency shadow.
        l3_s[r0:r1, :] = jnp.dot(h, w3l, preferred_element_type=f32)

    # Final state written exactly once.
    hn_ref[...] = h
    cn_ref[...] = c

    # ---------------- Phase 3: hoisted post-recurrence matmuls ---------------
    # linear3 on concat([fc, lstm_out]) == fc @ W3_fc + lstm_out @ W3_lstm;
    # the second term was accumulated per-step into l3_s above.
    z3 = jnp.maximum(
        jnp.dot(fc, w3fc_ref[...], preferred_element_type=f32)
        + l3_s[...] + b3_ref[...], 0.0)                              # (T*B, H)
    # linear4: single batched (T*B, H) @ (H, 1); one store (tiny at T*B=16).
    q_ref[...] = (
        jnp.dot(z3, w4_ref[...], preferred_element_type=f32) + b4_ref[...])


def _vspec(shape):
    zeros = (0,) * len(shape)
    return pl.BlockSpec(shape, lambda i, z=zeros: z)


@jax.jit
def qnetwork_lstm_forward(state, action, last_action, hidden_in, params):
    """Mirrors QNetworkLSTM.forward.

    state:       (B, T, state_dim)
    action:      (B, T, action_dim)
    last_action: (B, T, action_dim)
    hidden_in:   (h0, c0), each (1, B, hidden)
    Returns (q, (h_n, c_n)) with q of shape (B, T, 1).
    """
    h0, c0 = hidden_in
    B, T, state_dim = state.shape
    action_dim = action.shape[-1]
    H = params["w_hh"].shape[1]
    f32 = jnp.float32

    # Time-major, flattened (T*B, dim) slabs — no concat, state passed once.
    s_flat = jnp.transpose(state, (1, 0, 2)).reshape(T * B, state_dim).astype(f32)
    a_flat = jnp.transpose(action, (1, 0, 2)).reshape(T * B, action_dim).astype(f32)
    la_flat = jnp.transpose(last_action, (1, 0, 2)).reshape(T * B, action_dim).astype(f32)

    # Split W1/W2 into state / action column blocks (trace-time slices).
    w1t = params["w1"].T.astype(f32)                      # (D, H)
    w1s, w1a = w1t[:state_dim], w1t[state_dim:]
    b1 = params["b1"].reshape(1, H).astype(f32)
    w2t = params["w2"].T.astype(f32)                      # (D, H)
    w2s, w2la = w2t[:state_dim], w2t[state_dim:]
    b2 = params["b2"].reshape(1, H).astype(f32)

    # Gate-major LSTM weights (gate order [i, f, g, o] on the leading axis):
    # wih_gm[g] = W_ih[g*H:(g+1)*H, :].T  so that  x @ wih_gm[g] = x @ W_ih_g^T.
    wih_gm = params["w_ih"].astype(f32).reshape(4, H, H).transpose(0, 2, 1)
    whh_gm = params["w_hh"].astype(f32).reshape(4, H, H).transpose(0, 2, 1)
    bg_gm = (params["b_ih"] + params["b_hh"]).astype(f32).reshape(4, 1, H)

    w3t = params["w3"].T.astype(f32)                      # (2H, H)
    w3fc, w3lstm = w3t[:H], w3t[H:]                       # (H, H) each
    b3 = params["b3"].reshape(1, H).astype(f32)
    w4 = params["w4"].T.astype(f32)                       # (H, 1)
    b4 = params["b4"].reshape(1, 1).astype(f32)

    grid_spec = pltpu.PrefetchScalarGridSpec(
        num_scalar_prefetch=0,
        grid=(1,),                      # single invocation; loop lives in-kernel
        in_specs=[
            _vspec((T * B, state_dim)),                    # state (time-major)
            _vspec((T * B, action_dim)),                   # action
            _vspec((T * B, action_dim)),                   # last_action
            pl.BlockSpec((None, B, H), lambda i: (0, 0, 0)),   # h0 (squeeze lead)
            pl.BlockSpec((None, B, H), lambda i: (0, 0, 0)),   # c0 (squeeze lead)
            _vspec((state_dim, H)), _vspec((action_dim, H)), _vspec((1, H)),   # W1
            _vspec((state_dim, H)), _vspec((action_dim, H)), _vspec((1, H)),   # W2
            _vspec((4, H, H)),                             # W_ih (gate-major)
            _vspec((4, H, H)),                             # W_hh (gate-major)
            _vspec((4, 1, H)),                             # b_ih + b_hh
            _vspec((H, H)), _vspec((H, H)), _vspec((1, H)),    # W3_fc, W3_lstm, b3
            _vspec((H, 1)), _vspec((1, 1)),                    # W4, b4
        ],
        out_specs=[
            _vspec((T * B, 1)),         # q (flat, time-major rows)
            _vspec((B, H)),             # h_n
            _vspec((B, H)),             # c_n
        ],
        scratch_shapes=[
            pltpu.VMEM((T * B, H), jnp.float32),   # per-step W3_lstm contributions
        ],
    )

    q_flat, h_n, c_n = pl.pallas_call(
        functools.partial(_qnet_lstm_kernel, seq_len=T, batch=B, hidden_dim=H),
        grid_spec=grid_spec,
        out_shape=(
            jax.ShapeDtypeStruct((T * B, 1), jnp.float32),
            jax.ShapeDtypeStruct((B, H), jnp.float32),
            jax.ShapeDtypeStruct((B, H), jnp.float32),
        ),
        compiler_params=pltpu.CompilerParams(
            dimension_semantics=("arbitrary",),   # recurrence is sequential
        ),
    )(s_flat, a_flat, la_flat, h0.astype(f32), c0.astype(f32),
      w1s, w1a, b1, w2s, w2la, b2,
      wih_gm, whh_gm, bg_gm, w3fc, w3lstm, b3, w4, b4)

    q = jnp.transpose(q_flat.reshape(T, B, 1), (1, 0, 2))   # back to (B, T, 1)
    return q, (h_n[None], c_n[None])


def _reference_forward(state, action, last_action, hidden_in, params):
    """Pure-JAX reference replicating the PyTorch QNetworkLSTM semantics."""
    h0, c0 = hidden_in
    H = params["w_hh"].shape[1]
    s = jnp.transpose(state, (1, 0, 2))
    a = jnp.transpose(action, (1, 0, 2))
    la = jnp.transpose(last_action, (1, 0, 2))

    fc_branch = jax.nn.relu(
        jnp.concatenate([s, a], -1) @ params["w1"].T + params["b1"])
    lstm_in = jax.nn.relu(
        jnp.concatenate([s, la], -1) @ params["w2"].T + params["b2"])

    def step(carry, xt):
        h, c = carry
        gates = (xt @ params["w_ih"].T + params["b_ih"]
                 + h @ params["w_hh"].T + params["b_hh"])
        i_g = jax.nn.sigmoid(gates[:, 0 * H:1 * H])
        f_g = jax.nn.sigmoid(gates[:, 1 * H:2 * H])
        g_g = jnp.tanh(gates[:, 2 * H:3 * H])
        o_g = jax.nn.sigmoid(gates[:, 3 * H:4 * H])
        c = f_g * c + i_g * g_g
        h = o_g * jnp.tanh(c)
        return (h, c), h

    (h_n, c_n), hs = jax.lax.scan(step, (h0[0], c0[0]), lstm_in)
    merged = jnp.concatenate([fc_branch, hs], -1)
    z3 = jax.nn.relu(merged @ params["w3"].T + params["b3"])
    q = z3 @ params["w4"].T + params["b4"]
    return jnp.transpose(q, (1, 0, 2)), (h_n[None], c_n[None])


def _init_params(key, state_dim, action_dim, hidden_dim):
    D = state_dim + action_dim
    H = hidden_dim
    ks = jax.random.split(key, 12)
    u = lambda k, shape, s: jax.random.uniform(k, shape, jnp.float32, -s, s)
    return {
        "w1": u(ks[0], (H, D), 1.0 / jnp.sqrt(D)),
        "b1": u(ks[1], (H,), 1.0 / jnp.sqrt(D)),
        "w2": u(ks[2], (H, D), 1.0 / jnp.sqrt(D)),
        "b2": u(ks[3], (H,), 1.0 / jnp.sqrt(D)),
        "w_ih": u(ks[4], (4 * H, H), 1.0 / jnp.sqrt(H)),
        "b_ih": u(ks[5], (4 * H,), 1.0 / jnp.sqrt(H)),
        "w_hh": u(ks[6], (4 * H, H), 1.0 / jnp.sqrt(H)),
        "b_hh": u(ks[7], (4 * H,), 1.0 / jnp.sqrt(H)),
        "w3": u(ks[8], (H, 2 * H), 1.0 / jnp.sqrt(2 * H)),
        "b3": u(ks[9], (H,), 1.0 / jnp.sqrt(2 * H)),
        # linear4 uses linear_weights_init (small uniform) in the original code.
        "w4": u(ks[10], (1, H), 3e-3),
        "b4": u(ks[11], (1,), 3e-3),
    }


if __name__ == "__main__":
    B, T = 2, 8
    state_dim, action_dim, hidden_dim = 16, 4, 32

    key = jax.random.PRNGKey(0)
    k_s, k_a, k_la, k_h, k_c, k_p = jax.random.split(key, 6)

    state = jax.random.normal(k_s, (B, T, state_dim), jnp.float32)
    action = jax.random.normal(k_a, (B, T, action_dim), jnp.float32)
    last_action = jax.random.normal(k_la, (B, T, action_dim), jnp.float32)
    h0 = jax.random.normal(k_h, (1, B, hidden_dim), jnp.float32)
    c0 = jax.random.normal(k_c, (1, B, hidden_dim), jnp.float32)
    params = _init_params(k_p, state_dim, action_dim, hidden_dim)

    q, (h_n, c_n) = qnetwork_lstm_forward(state, action, last_action, (h0, c0), params)
    jax.block_until_ready((q, h_n, c_n))

    q_ref, (h_ref, c_ref) = _reference_forward(state, action, last_action, (h0, c0), params)
    assert q.shape == (B, T, 1)
    assert h_n.shape == (1, B, hidden_dim) and c_n.shape == (1, B, hidden_dim)
    assert jnp.allclose(q, q_ref, atol=2e-5, rtol=2e-5), float(jnp.max(jnp.abs(q - q_ref)))
    assert jnp.allclose(h_n, h_ref, atol=2e-5, rtol=2e-5), float(jnp.max(jnp.abs(h_n - h_ref)))
    assert jnp.allclose(c_n, c_ref, atol=2e-5, rtol=2e-5), float(jnp.max(jnp.abs(c_n - c_ref)))

    print("KERNEL_OK")
</pallas_src>

<mosaic_0001>
module attributes {stable_mosaic.version = 11 : i64} {
  func.func @_qnet_lstm_kernel(%arg0: i32, %arg1: memref<16x16xf32, #tpu.memory_space<vmem>>, %arg2: memref<16x4xf32, #tpu.memory_space<vmem>>, %arg3: memref<16x4xf32, #tpu.memory_space<vmem>>, %arg4: memref<1x2x32xf32, #tpu.memory_space<vmem>>, %arg5: memref<1x2x32xf32, #tpu.memory_space<vmem>>, %arg6: memref<16x32xf32, #tpu.memory_space<vmem>>, %arg7: memref<4x32xf32, #tpu.memory_space<vmem>>, %arg8: memref<1x32xf32, #tpu.memory_space<vmem>>, %arg9: memref<16x32xf32, #tpu.memory_space<vmem>>, %arg10: memref<4x32xf32, #tpu.memory_space<vmem>>, %arg11: memref<1x32xf32, #tpu.memory_space<vmem>>, %arg12: memref<4x32x32xf32, #tpu.memory_space<vmem>>, %arg13: memref<4x32x32xf32, #tpu.memory_space<vmem>>, %arg14: memref<4x1x32xf32, #tpu.memory_space<vmem>>, %arg15: memref<32x32xf32, #tpu.memory_space<vmem>>, %arg16: memref<32x32xf32, #tpu.memory_space<vmem>>, %arg17: memref<1x32xf32, #tpu.memory_space<vmem>>, %arg18: memref<32x1xf32, #tpu.memory_space<vmem>>, %arg19: memref<1x1xf32, #tpu.memory_space<vmem>>, %arg20: memref<16x1xf32, #tpu.memory_space<vmem>>, %arg21: memref<2x32xf32, #tpu.memory_space<vmem>>, %arg22: memref<2x32xf32, #tpu.memory_space<vmem>>, %arg23: memref<16x32xf32, #tpu.memory_space<vmem>>) attributes {dimension_semantics = [#tpu.dimension_semantics<arbitrary>], iteration_bounds = array<i64: 1>, scalar_prefetch = 0 : i64, scratch_operands = 1 : i64, tpu.core_type = #tpu.core_type<tc>, window_params = [{pipeline_mode = #tpu.pipeline_mode<synchronous>, transform_indices = @transform_0, window_bounds = array<i64: 16, 16>}, {pipeline_mode = #tpu.pipeline_mode<synchronous>, transform_indices = @transform_1, window_bounds = array<i64: 16, 4>}, {pipeline_mode = #tpu.pipeline_mode<synchronous>, transform_indices = @transform_2, window_bounds = array<i64: 16, 4>}, {pipeline_mode = #tpu.pipeline_mode<synchronous>, transform_indices = @transform_3, window_bounds = array<i64: 1, 2, 32>}, {pipeline_mode = #tpu.pipeline_mode<synchronous>, transform_indices = @transform_4, window_bounds = array<i64: 1, 2, 32>}, {pipeline_mode = #tpu.pipeline_mode<synchronous>, transform_indices = @transform_5, window_bounds = array<i64: 16, 32>}, {pipeline_mode = #tpu.pipeline_mode<synchronous>, transform_indices = @transform_6, window_bounds = array<i64: 4, 32>}, {pipeline_mode = #tpu.pipeline_mode<synchronous>, transform_indices = @transform_7, window_bounds = array<i64: 1, 32>}, {pipeline_mode = #tpu.pipeline_mode<synchronous>, transform_indices = @transform_8, window_bounds = array<i64: 16, 32>}, {pipeline_mode = #tpu.pipeline_mode<synchronous>, transform_indices = @transform_9, window_bounds = array<i64: 4, 32>}, {pipeline_mode = #tpu.pipeline_mode<synchronous>, transform_indices = @transform_10, window_bounds = array<i64: 1, 32>}, {pipeline_mode = #tpu.pipeline_mode<synchronous>, transform_indices = @transform_11, window_bounds = array<i64: 4, 32, 32>}, {pipeline_mode = #tpu.pipeline_mode<synchronous>, transform_indices = @transform_12, window_bounds = array<i64: 4, 32, 32>}, {pipeline_mode = #tpu.pipeline_mode<synchronous>, transform_indices = @transform_13, window_bounds = array<i64: 4, 1, 32>}, {pipeline_mode = #tpu.pipeline_mode<synchronous>, transform_indices = @transform_14, window_bounds = array<i64: 32, 32>}, {pipeline_mode = #tpu.pipeline_mode<synchronous>, transform_indices = @transform_15, window_bounds = array<i64: 32, 32>}, {pipeline_mode = #tpu.pipeline_mode<synchronous>, transform_indices = @transform_16, window_bounds = array<i64: 1, 32>}, {pipeline_mode = #tpu.pipeline_mode<synchronous>, transform_indices = @transform_17, window_bounds = array<i64: 32, 1>}, {pipeline_mode = #tpu.pipeline_mode<synchronous>, transform_indices = @transform_18, window_bounds = array<i64: 1, 1>}, {pipeline_mode = #tpu.pipeline_mode<synchronous>, transform_indices = @transform_19, window_bounds = array<i64: 16, 1>}, {pipeline_mode = #tpu.pipeline_mode<synchronous>, transform_indices = @transform_20, window_bounds = array<i64: 2, 32>}, {pipeline_mode = #tpu.pipeline_mode<synchronous>, transform_indices = @transform_21, window_bounds = array<i64: 2, 32>}]} {
    %c0 = arith.constant 0 : index
    %c0_0 = arith.constant 0 : index
    %0 = vector.load %arg1[%c0, %c0_0] : memref<16x16xf32, #tpu.memory_space<vmem>>, vector<16x16xf32>
    %c0_1 = arith.constant 0 : index
    %c0_2 = arith.constant 0 : index
    %1 = vector.load %arg6[%c0_1, %c0_2] : memref<16x32xf32, #tpu.memory_space<vmem>>, vector<16x32xf32>
    %cst = arith.constant dense<0.000000e+00> : vector<16x32xf32>
    %2 = tpu.matmul %0, %1, %cst {dimension_numbers = #tpu.dot_dimension_numbers<[1], [0], [0], [1], [0, 0, 1, 1], [], []>} : vector<16x16xf32>, vector<16x32xf32>, vector<16x32xf32> -> vector<16x32xf32>
    %c0_3 = arith.constant 0 : index
    %c0_4 = arith.constant 0 : index
    %3 = vector.load %arg2[%c0_3, %c0_4] : memref<16x4xf32, #tpu.memory_space<vmem>>, vector<16x4xf32>
    %c0_5 = arith.constant 0 : index
    %c0_6 = arith.constant 0 : index
    %4 = vector.load %arg7[%c0_5, %c0_6] : memref<4x32xf32, #tpu.memory_space<vmem>>, vector<4x32xf32>
    %cst_7 = arith.constant dense<0.000000e+00> : vector<16x32xf32>
    %5 = tpu.matmul %3, %4, %cst_7 {dimension_numbers = #tpu.dot_dimension_numbers<[1], [0], [0], [1], [0, 0, 1, 1], [], []>} : vector<16x4xf32>, vector<4x32xf32>, vector<16x32xf32> -> vector<16x32xf32>
    %6 = arith.addf %2, %5 : vector<16x32xf32>
    %c0_8 = arith.constant 0 : index
    %c0_9 = arith.constant 0 : index
    %7 = vector.load %arg8[%c0_8, %c0_9] : memref<1x32xf32, #tpu.memory_space<vmem>>, vector<1x32xf32>
    %8 = vector.broadcast %7 : vector<1x32xf32> to vector<16x32xf32>
    %9 = arith.addf %6, %8 : vector<16x32xf32>
    %cst_10 = arith.constant 0.000000e+00 : f32
    %10 = vector.broadcast %cst_10 : f32 to vector<16x32xf32>
    %11 = arith.maximumf %9, %10 : vector<16x32xf32>
    %c0_11 = arith.constant 0 : index
    %c0_12 = arith.constant 0 : index
    %12 = vector.load %arg9[%c0_11, %c0_12] : memref<16x32xf32, #tpu.memory_space<vmem>>, vector<16x32xf32>
    %cst_13 = arith.constant dense<0.000000e+00> : vector<16x32xf32>
    %13 = tpu.matmul %0, %12, %cst_13 {dimension_numbers = #tpu.dot_dimension_numbers<[1], [0], [0], [1], [0, 0, 1, 1], [], []>} : vector<16x16xf32>, vector<16x32xf32>, vector<16x32xf32> -> vector<16x32xf32>
    %c0_14 = arith.constant 0 : index
    %c0_15 = arith.constant 0 : index
    %14 = vector.load %arg3[%c0_14, %c0_15] : memref<16x4xf32, #tpu.memory_space<vmem>>, vector<16x4xf32>
    %c0_16 = arith.constant 0 : index
    %c0_17 = arith.constant 0 : index
    %15 = vector.load %arg10[%c0_16, %c0_17] : memref<4x32xf32, #tpu.memory_space<vmem>>, vector<4x32xf32>
    %cst_18 = arith.constant dense<0.000000e+00> : vector<16x32xf32>
    %16 = tpu.matmul %14, %15, %cst_18 {dimension_numbers = #tpu.dot_dimension_numbers<[1], [0], [0], [1], [0, 0, 1, 1], [], []>} : vector<16x4xf32>, vector<4x32xf32>, vector<16x32xf32> -> vector<16x32xf32>
    %17 = arith.addf %13, %16 : vector<16x32xf32>
    %c0_19 = arith.constant 0 : index
    %c0_20 = arith.constant 0 : index
    %18 = vector.load %arg11[%c0_19, %c0_20] : memref<1x32xf32, #tpu.memory_space<vmem>>, vector<1x32xf32>
    %19 = vector.broadcast %18 : vector<1x32xf32> to vector<16x32xf32>
    %20 = arith.addf %17, %19 : vector<16x32xf32>
    %cst_21 = arith.constant 0.000000e+00 : f32
    %21 = vector.broadcast %cst_21 : f32 to vector<16x32xf32>
    %22 = arith.maximumf %20, %21 : vector<16x32xf32>
    %c0_22 = arith.constant 0 : index
    %c0_23 = arith.constant 0 : index
    %c0_24 = arith.constant 0 : index
    %23 = vector.load %arg12[%c0_22, %c0_23, %c0_24] : memref<4x32x32xf32, #tpu.memory_space<vmem>>, vector<1x32x32xf32>
    %24 = vector.shape_cast %23 : vector<1x32x32xf32> to vector<32x32xf32>
    %cst_25 = arith.constant dense<0.000000e+00> : vector<16x32xf32>
    %25 = tpu.matmul %22, %24, %cst_25 {dimension_numbers = #tpu.dot_dimension_numbers<[1], [0], [0], [1], [0, 0, 1, 1], [], []>} : vector<16x32xf32>, vector<32x32xf32>, vector<16x32xf32> -> vector<16x32xf32>
    %c0_26 = arith.constant 0 : index
    %c0_27 = arith.constant 0 : index
    %c0_28 = arith.constant 0 : index
    %26 = vector.load %arg14[%c0_26, %c0_27, %c0_28] : memref<4x1x32xf32, #tpu.memory_space<vmem>>, vector<1x1x32xf32>
    %27 = vector.shape_cast %26 : vector<1x1x32xf32> to vector<1x32xf32>
    %28 = vector.broadcast %27 : vector<1x32xf32> to vector<16x32xf32>
    %29 = arith.addf %25, %28 : vector<16x32xf32>
    %c1 = arith.constant 1 : index
    %c0_29 = arith.constant 0 : index
    %c0_30 = arith.constant 0 : index
    %30 = vector.load %arg12[%c1, %c0_29, %c0_30] : memref<4x32x32xf32, #tpu.memory_space<vmem>>, vector<1x32x32xf32>
    %31 = vector.shape_cast %30 : vector<1x32x32xf32> to vector<32x32xf32>
    %cst_31 = arith.constant dense<0.000000e+00> : vector<16x32xf32>
    %32 = tpu.matmul %22, %31, %cst_31 {dimension_numbers = #tpu.dot_dimension_numbers<[1], [0], [0], [1], [0, 0, 1, 1], [], []>} : vector<16x32xf32>, vector<32x32xf32>, vector<16x32xf32> -> vector<16x32xf32>
    %c1_32 = arith.constant 1 : index
    %c0_33 = arith.constant 0 : index
    %c0_34 = arith.constant 0 : index
    %33 = vector.load %arg14[%c1_32, %c0_33, %c0_34] : memref<4x1x32xf32, #tpu.memory_space<vmem>>, vector<1x1x32xf32>
    %34 = vector.shape_cast %33 : vector<1x1x32xf32> to vector<1x32xf32>
    %35 = vector.broadcast %34 : vector<1x32xf32> to vector<16x32xf32>
    %36 = arith.addf %32, %35 : vector<16x32xf32>
    %c2 = arith.constant 2 : index
    %c0_35 = arith.constant 0 : index
    %c0_36 = arith.constant 0 : index
    %37 = vector.load %arg12[%c2, %c0_35, %c0_36] : memref<4x32x32xf32, #tpu.memory_space<vmem>>, vector<1x32x32xf32>
    %38 = vector.shape_cast %37 : vector<1x32x32xf32> to vector<32x32xf32>
    %cst_37 = arith.constant dense<0.000000e+00> : vector<16x32xf32>
    %39 = tpu.matmul %22, %38, %cst_37 {dimension_numbers = #tpu.dot_dimension_numbers<[1], [0], [0], [1], [0, 0, 1, 1], [], []>} : vector<16x32xf32>, vector<32x32xf32>, vector<16x32xf32> -> vector<16x32xf32>
    %c2_38 = arith.constant 2 : index
    %c0_39 = arith.constant 0 : index
    %c0_40 = arith.constant 0 : index
    %40 = vector.load %arg14[%c2_38, %c0_39, %c0_40] : memref<4x1x32xf32, #tpu.memory_space<vmem>>, vector<1x1x32xf32>
    %41 = vector.shape_cast %40 : vector<1x1x32xf32> to vector<1x32xf32>
    %42 = vector.broadcast %41 : vector<1x32xf32> to vector<16x32xf32>
    %43 = arith.addf %39, %42 : vector<16x32xf32>
    %c3 = arith.constant 3 : index
    %c0_41 = arith.constant 0 : index
    %c0_42 = arith.constant 0 : index
    %44 = vector.load %arg12[%c3, %c0_41, %c0_42] : memref<4x32x32xf32, #tpu.memory_space<vmem>>, vector<1x32x32xf32>
    %45 = vector.shape_cast %44 : vector<1x32x32xf32> to vector<32x32xf32>
    %cst_43 = arith.constant dense<0.000000e+00> : vector<16x32xf32>
    %46 = tpu.matmul %22, %45, %cst_43 {dimension_numbers = #tpu.dot_dimension_numbers<[1], [0], [0], [1], [0, 0, 1, 1], [], []>} : vector<16x32xf32>, vector<32x32xf32>, vector<16x32xf32> -> vector<16x32xf32>
    %c3_44 = arith.constant 3 : index
    %c0_45 = arith.constant 0 : index
    %c0_46 = arith.constant 0 : index
    %47 = vector.load %arg14[%c3_44, %c0_45, %c0_46] : memref<4x1x32xf32, #tpu.memory_space<vmem>>, vector<1x1x32xf32>
    %48 = vector.shape_cast %47 : vector<1x1x32xf32> to vector<1x32xf32>
    %49 = vector.broadcast %48 : vector<1x32xf32> to vector<16x32xf32>
    %50 = arith.addf %46, %49 : vector<16x32xf32>
    %c0_47 = arith.constant 0 : index
    %c0_48 = arith.constant 0 : index
    %c0_49 = arith.constant 0 : index
    %51 = vector.load %arg13[%c0_47, %c0_48, %c0_49] : memref<4x32x32xf32, #tpu.memory_space<vmem>>, vector<1x32x32xf32>
    %52 = vector.shape_cast %51 : vector<1x32x32xf32> to vector<32x32xf32>
    %c1_50 = arith.constant 1 : index
    %c0_51 = arith.constant 0 : index
    %c0_52 = arith.constant 0 : index
    %53 = vector.load %arg13[%c1_50, %c0_51, %c0_52] : memref<4x32x32xf32, #tpu.memory_space<vmem>>, vector<1x32x32xf32>
    %54 = vector.shape_cast %53 : vector<1x32x32xf32> to vector<32x32xf32>
    %c2_53 = arith.constant 2 : index
    %c0_54 = arith.constant 0 : index
    %c0_55 = arith.constant 0 : index
    %55 = vector.load %arg13[%c2_53, %c0_54, %c0_55] : memref<4x32x32xf32, #tpu.memory_space<vmem>>, vector<1x32x32xf32>
    %56 = vector.shape_cast %55 : vector<1x32x32xf32> to vector<32x32xf32>
    %c3_56 = arith.constant 3 : index
    %c0_57 = arith.constant 0 : index
    %c0_58 = arith.constant 0 : index
    %57 = vector.load %arg13[%c3_56, %c0_57, %c0_58] : memref<4x32x32xf32, #tpu.memory_space<vmem>>, vector<1x32x32xf32>
    %58 = vector.shape_cast %57 : vector<1x32x32xf32> to vector<32x32xf32>
    %c0_59 = arith.constant 0 : index
    %c0_60 = arith.constant 0 : index
    %59 = vector.load %arg16[%c0_59, %c0_60] : memref<32x32xf32, #tpu.memory_space<vmem>>, vector<32x32xf32>
    %c0_61 = arith.constant 0 : index
    %c0_62 = arith.constant 0 : index
    %c0_63 = arith.constant 0 : index
    %60 = vector.load %arg4[%c0_61, %c0_62, %c0_63] : memref<1x2x32xf32, #tpu.memory_space<vmem>>, vector<1x2x32xf32>
    %61 = vector.shape_cast %60 : vector<1x2x32xf32> to vector<2x32xf32>
    %c0_64 = arith.constant 0 : index
    %c0_65 = arith.constant 0 : index
    %c0_66 = arith.constant 0 : index
    %62 = vector.load %arg5[%c0_64, %c0_65, %c0_66] : memref<1x2x32xf32, #tpu.memory_space<vmem>>, vector<1x2x32xf32>
    %63 = vector.shape_cast %62 : vector<1x2x32xf32> to vector<2x32xf32>
    %64 = vector.extract_strided_slice %29 {offsets = [0, 0], sizes = [2, 32], strides = [1, 1]} : vector<16x32xf32> to vector<2x32xf32>
    %cst_67 = arith.constant dense<0.000000e+00> : vector<2x32xf32>
    %65 = tpu.matmul %61, %52, %cst_67 {dimension_numbers = #tpu.dot_dimension_numbers<[1], [0], [0], [1], [0, 0, 1, 1], [], []>} : vector<2x32xf32>, vector<32x32xf32>, vector<2x32xf32> -> vector<2x32xf32>
    %66 = arith.addf %64, %65 : vector<2x32xf32>
    %67 = vector.extract_strided_slice %36 {offsets = [0, 0], sizes = [2, 32], strides = [1, 1]} : vector<16x32xf32> to vector<2x32xf32>
    %cst_68 = arith.constant dense<0.000000e+00> : vector<2x32xf32>
    %68 = tpu.matmul %61, %54, %cst_68 {dimension_numbers = #tpu.dot_dimension_numbers<[1], [0], [0], [1], [0, 0, 1, 1], [], []>} : vector<2x32xf32>, vector<32x32xf32>, vector<2x32xf32> -> vector<2x32xf32>
    %69 = arith.addf %67, %68 : vector<2x32xf32>
    %70 = vector.extract_strided_slice %43 {offsets = [0, 0], sizes = [2, 32], strides = [1, 1]} : vector<16x32xf32> to vector<2x32xf32>
    %cst_69 = arith.constant dense<0.000000e+00> : vector<2x32xf32>
    %71 = tpu.matmul %61, %56, %cst_69 {dimension_numbers = #tpu.dot_dimension_numbers<[1], [0], [0], [1], [0, 0, 1, 1], [], []>} : vector<2x32xf32>, vector<32x32xf32>, vector<2x32xf32> -> vector<2x32xf32>
    %72 = arith.addf %70, %71 : vector<2x32xf32>
    %73 = vector.extract_strided_slice %50 {offsets = [0, 0], sizes = [2, 32], strides = [1, 1]} : vector<16x32xf32> to vector<2x32xf32>
    %cst_70 = arith.constant dense<0.000000e+00> : vector<2x32xf32>
    %74 = tpu.matmul %61, %58, %cst_70 {dimension_numbers = #tpu.dot_dimension_numbers<[1], [0], [0], [1], [0, 0, 1, 1], [], []>} : vector<2x32xf32>, vector<32x32xf32>, vector<2x32xf32> -> vector<2x32xf32>
    %75 = arith.addf %73, %74 : vector<2x32xf32>
    %76 = arith.negf %66 : vector<2x32xf32>
    %77 = math.exp %76 : vector<2x32xf32>
    %cst_71 = arith.constant 1.000000e+00 : f32
    %78 = vector.broadcast %cst_71 : f32 to vector<2x32xf32>
    %79 = arith.addf %78, %77 : vector<2x32xf32>
    %80 = arith.divf %78, %79 : vector<2x32xf32>
    %81 = arith.negf %69 : vector<2x32xf32>
    %82 = math.exp %81 : vector<2x32xf32>
    %cst_72 = arith.constant 1.000000e+00 : f32
    %83 = vector.broadcast %cst_72 : f32 to vector<2x32xf32>
    %84 = arith.addf %83, %82 : vector<2x32xf32>
    %85 = arith.divf %83, %84 : vector<2x32xf32>
    %86 = math.tanh %72 : vector<2x32xf32>
    %87 = arith.negf %75 : vector<2x32xf32>
    %88 = math.exp %87 : vector<2x32xf32>
    %cst_73 = arith.constant 1.000000e+00 : f32
    %89 = vector.broadcast %cst_73 : f32 to vector<2x32xf32>
    %90 = arith.addf %89, %88 : vector<2x32xf32>
    %91 = arith.divf %89, %90 : vector<2x32xf32>
    %92 = arith.mulf %85, %63 : vector<2x32xf32>
    %93 = arith.mulf %80, %86 : vector<2x32xf32>
    %94 = arith.addf %92, %93 : vector<2x32xf32>
    %95 = math.tanh %94 : vector<2x32xf32>
    %96 = arith.mulf %91, %95 : vector<2x32xf32>
    %cst_74 = arith.constant dense<0.000000e+00> : vector<2x32xf32>
    %97 = tpu.matmul %96, %59, %cst_74 {dimension_numbers = #tpu.dot_dimension_numbers<[1], [0], [0], [1], [0, 0, 1, 1], [], []>} : vector<2x32xf32>, vector<32x32xf32>, vector<2x32xf32> -> vector<2x32xf32>
    %c0_75 = arith.constant 0 : index
    %c0_76 = arith.constant 0 : index
    %98 = vector.load %arg23[%c0_75, %c0_76] : memref<16x32xf32, #tpu.memory_space<vmem>>, vector<2x32xf32>
    tpu.vector_store %arg23[%c0_75, %c0_76], %97 {strides = array<i32>} : memref<16x32xf32, #tpu.memory_space<vmem>>, vector<2x32xf32>,
    %99 = vector.extract_strided_slice %29 {offsets = [2, 0], sizes = [2, 32], strides = [1, 1]} : vector<16x32xf32> to vector<2x32xf32>
    %cst_77 = arith.constant dense<0.000000e+00> : vector<2x32xf32>
    %100 = tpu.matmul %96, %52, %cst_77 {dimension_numbers = #tpu.dot_dimension_numbers<[1], [0], [0], [1], [0, 0, 1, 1], [], []>} : vector<2x32xf32>, vector<32x32xf32>, vector<2x32xf32> -> vector<2x32xf32>
    %101 = arith.addf %99, %100 : vector<2x32xf32>
    %102 = vector.extract_strided_slice %36 {offsets = [2, 0], sizes = [2, 32], strides = [1, 1]} : vector<16x32xf32> to vector<2x32xf32>
    %cst_78 = arith.constant dense<0.000000e+00> : vector<2x32xf32>
    %103 = tpu.matmul %96, %54, %cst_78 {dimension_numbers = #tpu.dot_dimension_numbers<[1], [0], [0], [1], [0, 0, 1, 1], [], []>} : vector<2x32xf32>, vector<32x32xf32>, vector<2x32xf32> -> vector<2x32xf32>
    %104 = arith.addf %102, %103 : vector<2x32xf32>
    %105 = vector.extract_strided_slice %43 {offsets = [2, 0], sizes = [2, 32], strides = [1, 1]} : vector<16x32xf32> to vector<2x32xf32>
    %cst_79 = arith.constant dense<0.000000e+00> : vector<2x32xf32>
    %106 = tpu.matmul %96, %56, %cst_79 {dimension_numbers = #tpu.dot_dimension_numbers<[1], [0], [0], [1], [0, 0, 1, 1], [], []>} : vector<2x32xf32>, vector<32x32xf32>, vector<2x32xf32> -> vector<2x32xf32>
    %107 = arith.addf %105, %106 : vector<2x32xf32>
    %108 = vector.extract_strided_slice %50 {offsets = [2, 0], sizes = [2, 32], strides = [1, 1]} : vector<16x32xf32> to vector<2x32xf32>
    %cst_80 = arith.constant dense<0.000000e+00> : vector<2x32xf32>
    %109 = tpu.matmul %96, %58, %cst_80 {dimension_numbers = #tpu.dot_dimension_numbers<[1], [0], [0], [1], [0, 0, 1, 1], [], []>} : vector<2x32xf32>, vector<32x32xf32>, vector<2x32xf32> -> vector<2x32xf32>
    %110 = arith.addf %108, %109 : vector<2x32xf32>
    %111 = arith.negf %101 : vector<2x32xf32>
    %112 = math.exp %111 : vector<2x32xf32>
    %cst_81 = arith.constant 1.000000e+00 : f32
    %113 = vector.broadcast %cst_81 : f32 to vector<2x32xf32>
    %114 = arith.addf %113, %112 : vector<2x32xf32>
    %115 = arith.divf %113, %114 : vector<2x32xf32>
    %116 = arith.negf %104 : vector<2x32xf32>
    %117 = math.exp %116 : vector<2x32xf32>
    %cst_82 = arith.constant 1.000000e+00 : f32
    %118 = vector.broadcast %cst_82 : f32 to vector<2x32xf32>
    %119 = arith.addf %118, %117 : vector<2x32xf32>
    %120 = arith.divf %118, %119 : vector<2x32xf32>
    %121 = math.tanh %107 : vector<2x32xf32>
    %122 = arith.negf %110 : vector<2x32xf32>
    %123 = math.exp %122 : vector<2x32xf32>
    %cst_83 = arith.constant 1.000000e+00 : f32
    %124 = vector.broadcast %cst_83 : f32 to vector<2x32xf32>
    %125 = arith.addf %124, %123 : vector<2x32xf32>
    %126 = arith.divf %124, %125 : vector<2x32xf32>
    %127 = arith.mulf %120, %94 : vector<2x32xf32>
    %128 = arith.mulf %115, %121 : vector<2x32xf32>
    %129 = arith.addf %127, %128 : vector<2x32xf32>
    %130 = math.tanh %129 : vector<2x32xf32>
    %131 = arith.mulf %126, %130 : vector<2x32xf32>
    %cst_84 = arith.constant dense<0.000000e+00> : vector<2x32xf32>
    %132 = tpu.matmul %131, %59, %cst_84 {dimension_numbers = #tpu.dot_dimension_numbers<[1], [0], [0], [1], [0, 0, 1, 1], [], []>} : vector<2x32xf32>, vector<32x32xf32>, vector<2x32xf32> -> vector<2x32xf32>
    %c2_85 = arith.constant 2 : index
    %c0_86 = arith.constant 0 : index
    %133 = vector.load %arg23[%c2_85, %c0_86] : memref<16x32xf32, #tpu.memory_space<vmem>>, vector<2x32xf32>
    tpu.vector_store %arg23[%c2_85, %c0_86], %132 {strides = array<i32>} : memref<16x32xf32, #tpu.memory_space<vmem>>, vector<2x32xf32>,
    %134 = vector.extract_strided_slice %29 {offsets = [4, 0], sizes = [2, 32], strides = [1, 1]} : vector<16x32xf32> to vector<2x32xf32>
    %cst_87 = arith.constant dense<0.000000e+00> : vector<2x32xf32>
    %135 = tpu.matmul %131, %52, %cst_87 {dimension_numbers = #tpu.dot_dimension_numbers<[1], [0], [0], [1], [0, 0, 1, 1], [], []>} : vector<2x32xf32>, vector<32x32xf32>, vector<2x32xf32> -> vector<2x32xf32>
    %136 = arith.addf %134, %135 : vector<2x32xf32>
    %137 = vector.extract_strided_slice %36 {offsets = [4, 0], sizes = [2, 32], strides = [1, 1]} : vector<16x32xf32> to vector<2x32xf32>
    %cst_88 = arith.constant dense<0.000000e+00> : vector<2x32xf32>
    %138 = tpu.matmul %131, %54, %cst_88 {dimension_numbers = #tpu.dot_dimension_numbers<[1], [0], [0], [1], [0, 0, 1, 1], [], []>} : vector<2x32xf32>, vector<32x32xf32>, vector<2x32xf32> -> vector<2x32xf32>
    %139 = arith.addf %137, %138 : vector<2x32xf32>
    %140 = vector.extract_strided_slice %43 {offsets = [4, 0], sizes = [2, 32], strides = [1, 1]} : vector<16x32xf32> to vector<2x32xf32>
    %cst_89 = arith.constant dense<0.000000e+00> : vector<2x32xf32>
    %141 = tpu.matmul %131, %56, %cst_89 {dimension_numbers = #tpu.dot_dimension_numbers<[1], [0], [0], [1], [0, 0, 1, 1], [], []>} : vector<2x32xf32>, vector<32x32xf32>, vector<2x32xf32> -> vector<2x32xf32>
    %142 = arith.addf %140, %141 : vector<2x32xf32>
    %143 = vector.extract_strided_slice %50 {offsets = [4, 0], sizes = [2, 32], strides = [1, 1]} : vector<16x32xf32> to vector<2x32xf32>
    %cst_90 = arith.constant dense<0.000000e+00> : vector<2x32xf32>
    %144 = tpu.matmul %131, %58, %cst_90 {dimension_numbers = #tpu.dot_dimension_numbers<[1], [0], [0], [1], [0, 0, 1, 1], [], []>} : vector<2x32xf32>, vector<32x32xf32>, vector<2x32xf32> -> vector<2x32xf32>
    %145 = arith.addf %143, %144 : vector<2x32xf32>
    %146 = arith.negf %136 : vector<2x32xf32>
    %147 = math.exp %146 : vector<2x32xf32>
    %cst_91 = arith.constant 1.000000e+00 : f32
    %148 = vector.broadcast %cst_91 : f32 to vector<2x32xf32>
    %149 = arith.addf %148, %147 : vector<2x32xf32>
    %150 = arith.divf %148, %149 : vector<2x32xf32>
    %151 = arith.negf %139 : vector<2x32xf32>
    %152 = math.exp %151 : vector<2x32xf32>
    %cst_92 = arith.constant 1.000000e+00 : f32
    %153 = vector.broadcast %cst_92 : f32 to vector<2x32xf32>
    %154 = arith.addf %153, %152 : vector<2x32xf32>
    %155 = arith.divf %153, %154 : vector<2x32xf32>
    %156 = math.tanh %142 : vector<2x32xf32>
    %157 = arith.negf %145 : vector<2x32xf32>
    %158 = math.exp %157 : vector<2x32xf32>
    %cst_93 = arith.constant 1.000000e+00 : f32
    %159 = vector.broadcast %cst_93 : f32 to vector<2x32xf32>
    %160 = arith.addf %159, %158 : vector<2x32xf32>
    %161 = arith.divf %159, %160 : vector<2x32xf32>
    %162 = arith.mulf %155, %129 : vector<2x32xf32>
    %163 = arith.mulf %150, %156 : vector<2x32xf32>
    %164 = arith.addf %162, %163 : vector<2x32xf32>
    %165 = math.tanh %164 : vector<2x32xf32>
    %166 = arith.mulf %161, %165 : vector<2x32xf32>
    %cst_94 = arith.constant dense<0.000000e+00> : vector<2x32xf32>
    %167 = tpu.matmul %166, %59, %cst_94 {dimension_numbers = #tpu.dot_dimension_numbers<[1], [0], [0], [1], [0, 0, 1, 1], [], []>} : vector<2x32xf32>, vector<32x32xf32>, vector<2x32xf32> -> vector<2x32xf32>
    %c4 = arith.constant 4 : index
    %c0_95 = arith.constant 0 : index
    %168 = vector.load %arg23[%c4, %c0_95] : memref<16x32xf32, #tpu.memory_space<vmem>>, vector<2x32xf32>
    tpu.vector_store %arg23[%c4, %c0_95], %167 {strides = array<i32>} : memref<16x32xf32, #tpu.memory_space<vmem>>, vector<2x32xf32>,
    %169 = vector.extract_strided_slice %29 {offsets = [6, 0], sizes = [2, 32], strides = [1, 1]} : vector<16x32xf32> to vector<2x32xf32>
    %cst_96 = arith.constant dense<0.000000e+00> : vector<2x32xf32>
    %170 = tpu.matmul %166, %52, %cst_96 {dimension_numbers = #tpu.dot_dimension_numbers<[1], [0], [0], [1], [0, 0, 1, 1], [], []>} : vector<2x32xf32>, vector<32x32xf32>, vector<2x32xf32> -> vector<2x32xf32>
    %171 = arith.addf %169, %170 : vector<2x32xf32>
    %172 = vector.extract_strided_slice %36 {offsets = [6, 0], sizes = [2, 32], strides = [1, 1]} : vector<16x32xf32> to vector<2x32xf32>
    %cst_97 = arith.constant dense<0.000000e+00> : vector<2x32xf32>
    %173 = tpu.matmul %166, %54, %cst_97 {dimension_numbers = #tpu.dot_dimension_numbers<[1], [0], [0], [1], [0, 0, 1, 1], [], []>} : vector<2x32xf32>, vector<32x32xf32>, vector<2x32xf32> -> vector<2x32xf32>
    %174 = arith.addf %172, %173 : vector<2x32xf32>
    %175 = vector.extract_strided_slice %43 {offsets = [6, 0], sizes = [2, 32], strides = [1, 1]} : vector<16x32xf32> to vector<2x32xf32>
    %cst_98 = arith.constant dense<0.000000e+00> : vector<2x32xf32>
    %176 = tpu.matmul %166, %56, %cst_98 {dimension_numbers = #tpu.dot_dimension_numbers<[1], [0], [0], [1], [0, 0, 1, 1], [], []>} : vector<2x32xf32>, vector<32x32xf32>, vector<2x32xf32> -> vector<2x32xf32>
    %177 = arith.addf %175, %176 : vector<2x32xf32>
    %178 = vector.extract_strided_slice %50 {offsets = [6, 0], sizes = [2, 32], strides = [1, 1]} : vector<16x32xf32> to vector<2x32xf32>
    %cst_99 = arith.constant dense<0.000000e+00> : vector<2x32xf32>
    %179 = tpu.matmul %166, %58, %cst_99 {dimension_numbers = #tpu.dot_dimension_numbers<[1], [0], [0], [1], [0, 0, 1, 1], [], []>} : vector<2x32xf32>, vector<32x32xf32>, vector<2x32xf32> -> vector<2x32xf32>
    %180 = arith.addf %178, %179 : vector<2x32xf32>
    %181 = arith.negf %171 : vector<2x32xf32>
    %182 = math.exp %181 : vector<2x32xf32>
    %cst_100 = arith.constant 1.000000e+00 : f32
    %183 = vector.broadcast %cst_100 : f32 to vector<2x32xf32>
    %184 = arith.addf %183, %182 : vector<2x32xf32>
    %185 = arith.divf %183, %184 : vector<2x32xf32>
    %186 = arith.negf %174 : vector<2x32xf32>
    %187 = math.exp %186 : vector<2x32xf32>
    %cst_101 = arith.constant 1.000000e+00 : f32
    %188 = vector.broadcast %cst_101 : f32 to vector<2x32xf32>
    %189 = arith.addf %188, %187 : vector<2x32xf32>
    %190 = arith.divf %188, %189 : vector<2x32xf32>
    %191 = math.tanh %177 : vector<2x32xf32>
    %192 = arith.negf %180 : vector<2x32xf32>
    %193 = math.exp %192 : vector<2x32xf32>
    %cst_102 = arith.constant 1.000000e+00 : f32
    %194 = vector.broadcast %cst_102 : f32 to vector<2x32xf32>
    %195 = arith.addf %194, %193 : vector<2x32xf32>
    %196 = arith.divf %194, %195 : vector<2x32xf32>
    %197 = arith.mulf %190, %164 : vector<2x32xf32>
    %198 = arith.mulf %185, %191 : vector<2x32xf32>
    %199 = arith.addf %197, %198 : vector<2x32xf32>
    %200 = math.tanh %199 : vector<2x32xf32>
    %201 = arith.mulf %196, %200 : vector<2x32xf32>
    %cst_103 = arith.constant dense<0.000000e+00> : vector<2x32xf32>
    %202 = tpu.matmul %201, %59, %cst_103 {dimension_numbers = #tpu.dot_dimension_numbers<[1], [0], [0], [1], [0, 0, 1, 1], [], []>} : vector<2x32xf32>, vector<32x32xf32>, vector<2x32xf32> -> vector<2x32xf32>
    %c6 = arith.constant 6 : index
    %c0_104 = arith.constant 0 : index
    %203 = vector.load %arg23[%c6, %c0_104] : memref<16x32xf32, #tpu.memory_space<vmem>>, vector<2x32xf32>
    tpu.vector_store %arg23[%c6, %c0_104], %202 {strides = array<i32>} : memref<16x32xf32, #tpu.memory_space<vmem>>, vector<2x32xf32>,
    %204 = vector.extract_strided_slice %29 {offsets = [8, 0], sizes = [2, 32], strides = [1, 1]} : vector<16x32xf32> to vector<2x32xf32>
    %cst_105 = arith.constant dense<0.000000e+00> : vector<2x32xf32>
    %205 = tpu.matmul %201, %52, %cst_105 {dimension_numbers = #tpu.dot_dimension_numbers<[1], [0], [0], [1], [0, 0, 1, 1], [], []>} : vector<2x32xf32>, vector<32x32xf32>, vector<2x32xf32> -> vector<2x32xf32>
    %206 = arith.addf %204, %205 : vector<2x32xf32>
    %207 = vector.extract_strided_slice %36 {offsets = [8, 0], sizes = [2, 32], strides = [1, 1]} : vector<16x32xf32> to vector<2x32xf32>
    %cst_106 = arith.constant dense<0.000000e+00> : vector<2x32xf32>
    %208 = tpu.matmul %201, %54, %cst_106 {dimension_numbers = #tpu.dot_dimension_numbers<[1], [0], [0], [1], [0, 0, 1, 1], [], []>} : vector<2x32xf32>, vector<32x32xf32>, vector<2x32xf32> -> vector<2x32xf32>
    %209 = arith.addf %207, %208 : vector<2x32xf32>
    %210 = vector.extract_strided_slice %43 {offsets = [8, 0], sizes = [2, 32], strides = [1, 1]} : vector<16x32xf32> to vector<2x32xf32>
    %cst_107 = arith.constant dense<0.000000e+00> : vector<2x32xf32>
    %211 = tpu.matmul %201, %56, %cst_107 {dimension_numbers = #tpu.dot_dimension_numbers<[1], [0], [0], [1], [0, 0, 1, 1], [], []>} : vector<2x32xf32>, vector<32x32xf32>, vector<2x32xf32> -> vector<2x32xf32>
    %212 = arith.addf %210, %211 : vector<2x32xf32>
    %213 = vector.extract_strided_slice %50 {offsets = [8, 0], sizes = [2, 32], strides = [1, 1]} : vector<16x32xf32> to vector<2x32xf32>
    %cst_108 = arith.constant dense<0.000000e+00> : vector<2x32xf32>
    %214 = tpu.matmul %201, %58, %cst_108 {dimension_numbers = #tpu.dot_dimension_numbers<[1], [0], [0], [1], [0, 0, 1, 1], [], []>} : vector<2x32xf32>, vector<32x32xf32>, vector<2x32xf32> -> vector<2x32xf32>
    %215 = arith.addf %213, %214 : vector<2x32xf32>
    %216 = arith.negf %206 : vector<2x32xf32>
    %217 = math.exp %216 : vector<2x32xf32>
    %cst_109 = arith.constant 1.000000e+00 : f32
    %218 = vector.broadcast %cst_109 : f32 to vector<2x32xf32>
    %219 = arith.addf %218, %217 : vector<2x32xf32>
    %220 = arith.divf %218, %219 : vector<2x32xf32>
    %221 = arith.negf %209 : vector<2x32xf32>
    %222 = math.exp %221 : vector<2x32xf32>
    %cst_110 = arith.constant 1.000000e+00 : f32
    %223 = vector.broadcast %cst_110 : f32 to vector<2x32xf32>
    %224 = arith.addf %223, %222 : vector<2x32xf32>
    %225 = arith.divf %223, %224 : vector<2x32xf32>
    %226 = math.tanh %212 : vector<2x32xf32>
    %227 = arith.negf %215 : vector<2x32xf32>
    %228 = math.exp %227 : vector<2x32xf32>
    %cst_111 = arith.constant 1.000000e+00 : f32
    %229 = vector.broadcast %cst_111 : f32 to vector<2x32xf32>
    %230 = arith.addf %229, %228 : vector<2x32xf32>
    %231 = arith.divf %229, %230 : vector<2x32xf32>
    %232 = arith.mulf %225, %199 : vector<2x32xf32>
    %233 = arith.mulf %220, %226 : vector<2x32xf32>
    %234 = arith.addf %232, %233 : vector<2x32xf32>
    %235 = math.tanh %234 : vector<2x32xf32>
    %236 = arith.mulf %231, %235 : vector<2x32xf32>
    %cst_112 = arith.constant dense<0.000000e+00> : vector<2x32xf32>
    %237 = tpu.matmul %236, %59, %cst_112 {dimension_numbers = #tpu.dot_dimension_numbers<[1], [0], [0], [1], [0, 0, 1, 1], [], []>} : vector<2x32xf32>, vector<32x32xf32>, vector<2x32xf32> -> vector<2x32xf32>
    %c8 = arith.constant 8 : index
    %c0_113 = arith.constant 0 : index
    %238 = vector.load %arg23[%c8, %c0_113] : memref<16x32xf32, #tpu.memory_space<vmem>>, vector<2x32xf32>
    tpu.vector_store %arg23[%c8, %c0_113], %237 {strides = array<i32>} : memref<16x32xf32, #tpu.memory_space<vmem>>, vector<2x32xf32>,
    %239 = vector.extract_strided_slice %29 {offsets = [10, 0], sizes = [2, 32], strides = [1, 1]} : vector<16x32xf32> to vector<2x32xf32>
    %cst_114 = arith.constant dense<0.000000e+00> : vector<2x32xf32>
    %240 = tpu.matmul %236, %52, %cst_114 {dimension_numbers = #tpu.dot_dimension_numbers<[1], [0], [0], [1], [0, 0, 1, 1], [], []>} : vector<2x32xf32>, vector<32x32xf32>, vector<2x32xf32> -> vector<2x32xf32>
    %241 = arith.addf %239, %240 : vector<2x32xf32>
    %242 = vector.extract_strided_slice %36 {offsets = [10, 0], sizes = [2, 32], strides = [1, 1]} : vector<16x32xf32> to vector<2x32xf32>
    %cst_115 = arith.constant dense<0.000000e+00> : vector<2x32xf32>
    %243 = tpu.matmul %236, %54, %cst_115 {dimension_numbers = #tpu.dot_dimension_numbers<[1], [0], [0], [1], [0, 0, 1, 1], [], []>} : vector<2x32xf32>, vector<32x32xf32>, vector<2x32xf32> -> vector<2x32xf32>
    %244 = arith.addf %242, %243 : vector<2x32xf32>
    %245 = vector.extract_strided_slice %43 {offsets = [10, 0], sizes = [2, 32], strides = [1, 1]} : vector<16x32xf32> to vector<2x32xf32>
    %cst_116 = arith.constant dense<0.000000e+00> : vector<2x32xf32>
    %246 = tpu.matmul %236, %56, %cst_116 {dimension_numbers = #tpu.dot_dimension_numbers<[1], [0], [0], [1], [0, 0, 1, 1], [], []>} : vector<2x32xf32>, vector<32x32xf32>, vector<2x32xf32> -> vector<2x32xf32>
    %247 = arith.addf %245, %246 : vector<2x32xf32>
    %248 = vector.extract_strided_slice %50 {offsets = [10, 0], sizes = [2, 32], strides = [1, 1]} : vector<16x32xf32> to vector<2x32xf32>
    %cst_117 = arith.constant dense<0.000000e+00> : vector<2x32xf32>
    %249 = tpu.matmul %236, %58, %cst_117 {dimension_numbers = #tpu.dot_dimension_numbers<[1], [0], [0], [1], [0, 0, 1, 1], [], []>} : vector<2x32xf32>, vector<32x32xf32>, vector<2x32xf32> -> vector<2x32xf32>
    %250 = arith.addf %248, %249 : vector<2x32xf32>
    %251 = arith.negf %241 : vector<2x32xf32>
    %252 = math.exp %251 : vector<2x32xf32>
    %cst_118 = arith.constant 1.000000e+00 : f32
    %253 = vector.broadcast %cst_118 : f32 to vector<2x32xf32>
    %254 = arith.addf %253, %252 : vector<2x32xf32>
    %255 = arith.divf %253, %254 : vector<2x32xf32>
    %256 = arith.negf %244 : vector<2x32xf32>
    %257 = math.exp %256 : vector<2x32xf32>
    %cst_119 = arith.constant 1.000000e+00 : f32
    %258 = vector.broadcast %cst_119 : f32 to vector<2x32xf32>
    %259 = arith.addf %258, %257 : vector<2x32xf32>
    %260 = arith.divf %258, %259 : vector<2x32xf32>
    %261 = math.tanh %247 : vector<2x32xf32>
    %262 = arith.negf %250 : vector<2x32xf32>
    %263 = math.exp %262 : vector<2x32xf32>
    %cst_120 = arith.constant 1.000000e+00 : f32
    %264 = vector.broadcast %cst_120 : f32 to vector<2x32xf32>
    %265 = arith.addf %264, %263 : vector<2x32xf32>
    %266 = arith.divf %264, %265 : vector<2x32xf32>
    %267 = arith.mulf %260, %234 : vector<2x32xf32>
    %268 = arith.mulf %255, %261 : vector<2x32xf32>
    %269 = arith.addf %267, %268 : vector<2x32xf32>
    %270 = math.tanh %269 : vector<2x32xf32>
    %271 = arith.mulf %266, %270 : vector<2x32xf32>
    %cst_121 = arith.constant dense<0.000000e+00> : vector<2x32xf32>
    %272 = tpu.matmul %271, %59, %cst_121 {dimension_numbers = #tpu.dot_dimension_numbers<[1], [0], [0], [1], [0, 0, 1, 1], [], []>} : vector<2x32xf32>, vector<32x32xf32>, vector<2x32xf32> -> vector<2x32xf32>
    %c10 = arith.constant 10 : index
    %c0_122 = arith.constant 0 : index
    %273 = vector.load %arg23[%c10, %c0_122] : memref<16x32xf32, #tpu.memory_space<vmem>>, vector<2x32xf32>
    tpu.vector_store %arg23[%c10, %c0_122], %272 {strides = array<i32>} : memref<16x32xf32, #tpu.memory_space<vmem>>, vector<2x32xf32>,
    %274 = vector.extract_strided_slice %29 {offsets = [12, 0], sizes = [2, 32], strides = [1, 1]} : vector<16x32xf32> to vector<2x32xf32>
    %cst_123 = arith.constant dense<0.000000e+00> : vector<2x32xf32>
    %275 = tpu.matmul %271, %52, %cst_123 {dimension_numbers = #tpu.dot_dimension_numbers<[1], [0], [0], [1], [0, 0, 1, 1], [], []>} : vector<2x32xf32>, vector<32x32xf32>, vector<2x32xf32> -> vector<2x32xf32>
    %276 = arith.addf %274, %275 : vector<2x32xf32>
    %277 = vector.extract_strided_slice %36 {offsets = [12, 0], sizes = [2, 32], strides = [1, 1]} : vector<16x32xf32> to vector<2x32xf32>
    %cst_124 = arith.constant dense<0.000000e+00> : vector<2x32xf32>
    %278 = tpu.matmul %271, %54, %cst_124 {dimension_numbers = #tpu.dot_dimension_numbers<[1], [0], [0], [1], [0, 0, 1, 1], [], []>} : vector<2x32xf32>, vector<32x32xf32>, vector<2x32xf32> -> vector<2x32xf32>
    %279 = arith.addf %277, %278 : vector<2x32xf32>
    %280 = vector.extract_strided_slice %43 {offsets = [12, 0], sizes = [2, 32], strides = [1, 1]} : vector<16x32xf32> to vector<2x32xf32>
    %cst_125 = arith.constant dense<0.000000e+00> : vector<2x32xf32>
    %281 = tpu.matmul %271, %56, %cst_125 {dimension_numbers = #tpu.dot_dimension_numbers<[1], [0], [0], [1], [0, 0, 1, 1], [], []>} : vector<2x32xf32>, vector<32x32xf32>, vector<2x32xf32> -> vector<2x32xf32>
    %282 = arith.addf %280, %281 : vector<2x32xf32>
    %283 = vector.extract_strided_slice %50 {offsets = [12, 0], sizes = [2, 32], strides = [1, 1]} : vector<16x32xf32> to vector<2x32xf32>
    %cst_126 = arith.constant dense<0.000000e+00> : vector<2x32xf32>
    %284 = tpu.matmul %271, %58, %cst_126 {dimension_numbers = #tpu.dot_dimension_numbers<[1], [0], [0], [1], [0, 0, 1, 1], [], []>} : vector<2x32xf32>, vector<32x32xf32>, vector<2x32xf32> -> vector<2x32xf32>
    %285 = arith.addf %283, %284 : vector<2x32xf32>
    %286 = arith.negf %276 : vector<2x32xf32>
    %287 = math.exp %286 : vector<2x32xf32>
    %cst_127 = arith.constant 1.000000e+00 : f32
    %288 = vector.broadcast %cst_127 : f32 to vector<2x32xf32>
    %289 = arith.addf %288, %287 : vector<2x32xf32>
    %290 = arith.divf %288, %289 : vector<2x32xf32>
    %291 = arith.negf %279 : vector<2x32xf32>
    %292 = math.exp %291 : vector<2x32xf32>
    %cst_128 = arith.constant 1.000000e+00 : f32
    %293 = vector.broadcast %cst_128 : f32 to vector<2x32xf32>
    %294 = arith.addf %293, %292 : vector<2x32xf32>
    %295 = arith.divf %293, %294 : vector<2x32xf32>
    %296 = math.tanh %282 : vector<2x32xf32>
    %297 = arith.negf %285 : vector<2x32xf32>
    %298 = math.exp %297 : vector<2x32xf32>
    %cst_129 = arith.constant 1.000000e+00 : f32
    %299 = vector.broadcast %cst_129 : f32 to vector<2x32xf32>
    %300 = arith.addf %299, %298 : vector<2x32xf32>
    %301 = arith.divf %299, %300 : vector<2x32xf32>
    %302 = arith.mulf %295, %269 : vector<2x32xf32>
    %303 = arith.mulf %290, %296 : vector<2x32xf32>
    %304 = arith.addf %302, %303 : vector<2x32xf32>
    %305 = math.tanh %304 : vector<2x32xf32>
    %306 = arith.mulf %301, %305 : vector<2x32xf32>
    %cst_130 = arith.constant dense<0.000000e+00> : vector<2x32xf32>
    %307 = tpu.matmul %306, %59, %cst_130 {dimension_numbers = #tpu.dot_dimension_numbers<[1], [0], [0], [1], [0, 0, 1, 1], [], []>} : vector<2x32xf32>, vector<32x32xf32>, vector<2x32xf32> -> vector<2x32xf32>
    %c12 = arith.constant 12 : index
    %c0_131 = arith.constant 0 : index
    %308 = vector.load %arg23[%c12, %c0_131] : memref<16x32xf32, #tpu.memory_space<vmem>>, vector<2x32xf32>
    tpu.vector_store %arg23[%c12, %c0_131], %307 {strides = array<i32>} : memref<16x32xf32, #tpu.memory_space<vmem>>, vector<2x32xf32>,
    %309 = vector.extract_strided_slice %29 {offsets = [14, 0], sizes = [2, 32], strides = [1, 1]} : vector<16x32xf32> to vector<2x32xf32>
    %cst_132 = arith.constant dense<0.000000e+00> : vector<2x32xf32>
    %310 = tpu.matmul %306, %52, %cst_132 {dimension_numbers = #tpu.dot_dimension_numbers<[1], [0], [0], [1], [0, 0, 1, 1], [], []>} : vector<2x32xf32>, vector<32x32xf32>, vector<2x32xf32> -> vector<2x32xf32>
    %311 = arith.addf %309, %310 : vector<2x32xf32>
    %312 = vector.extract_strided_slice %36 {offsets = [14, 0], sizes = [2, 32], strides = [1, 1]} : vector<16x32xf32> to vector<2x32xf32>
    %cst_133 = arith.constant dense<0.000000e+00> : vector<2x32xf32>
    %313 = tpu.matmul %306, %54, %cst_133 {dimension_numbers = #tpu.dot_dimension_numbers<[1], [0], [0], [1], [0, 0, 1, 1], [], []>} : vector<2x32xf32>, vector<32x32xf32>, vector<2x32xf32> -> vector<2x32xf32>
    %314 = arith.addf %312, %313 : vector<2x32xf32>
    %315 = vector.extract_strided_slice %43 {offsets = [14, 0], sizes = [2, 32], strides = [1, 1]} : vector<16x32xf32> to vector<2x32xf32>
    %cst_134 = arith.constant dense<0.000000e+00> : vector<2x32xf32>
    %316 = tpu.matmul %306, %56, %cst_134 {dimension_numbers = #tpu.dot_dimension_numbers<[1], [0], [0], [1], [0, 0, 1, 1], [], []>} : vector<2x32xf32>, vector<32x32xf32>, vector<2x32xf32> -> vector<2x32xf32>
    %317 = arith.addf %315, %316 : vector<2x32xf32>
    %318 = vector.extract_strided_slice %50 {offsets = [14, 0], sizes = [2, 32], strides = [1, 1]} : vector<16x32xf32> to vector<2x32xf32>
    %cst_135 = arith.constant dense<0.000000e+00> : vector<2x32xf32>
    %319 = tpu.matmul %306, %58, %cst_135 {dimension_numbers = #tpu.dot_dimension_numbers<[1], [0], [0], [1], [0, 0, 1, 1], [], []>} : vector<2x32xf32>, vector<32x32xf32>, vector<2x32xf32> -> vector<2x32xf32>
    %320 = arith.addf %318, %319 : vector<2x32xf32>
    %321 = arith.negf %311 : vector<2x32xf32>
    %322 = math.exp %321 : vector<2x32xf32>
    %cst_136 = arith.constant 1.000000e+00 : f32
    %323 = vector.broadcast %cst_136 : f32 to vector<2x32xf32>
    %324 = arith.addf %323, %322 : vector<2x32xf32>
    %325 = arith.divf %323, %324 : vector<2x32xf32>
    %326 = arith.negf %314 : vector<2x32xf32>
    %327 = math.exp %326 : vector<2x32xf32>
    %cst_137 = arith.constant 1.000000e+00 : f32
    %328 = vector.broadcast %cst_137 : f32 to vector<2x32xf32>
    %329 = arith.addf %328, %327 : vector<2x32xf32>
    %330 = arith.divf %328, %329 : vector<2x32xf32>
    %331 = math.tanh %317 : vector<2x32xf32>
    %332 = arith.negf %320 : vector<2x32xf32>
    %333 = math.exp %332 : vector<2x32xf32>
    %cst_138 = arith.constant 1.000000e+00 : f32
    %334 = vector.broadcast %cst_138 : f32 to vector<2x32xf32>
    %335 = arith.addf %334, %333 : vector<2x32xf32>
    %336 = arith.divf %334, %335 : vector<2x32xf32>
    %337 = arith.mulf %330, %304 : vector<2x32xf32>
    %338 = arith.mulf %325, %331 : vector<2x32xf32>
    %339 = arith.addf %337, %338 : vector<2x32xf32>
    %340 = math.tanh %339 : vector<2x32xf32>
    %341 = arith.mulf %336, %340 : vector<2x32xf32>
    %cst_139 = arith.constant dense<0.000000e+00> : vector<2x32xf32>
    %342 = tpu.matmul %341, %59, %cst_139 {dimension_numbers = #tpu.dot_dimension_numbers<[1], [0], [0], [1], [0, 0, 1, 1], [], []>} : vector<2x32xf32>, vector<32x32xf32>, vector<2x32xf32> -> vector<2x32xf32>
    %c14 = arith.constant 14 : index
    %c0_140 = arith.constant 0 : index
    %343 = vector.load %arg23[%c14, %c0_140] : memref<16x32xf32, #tpu.memory_space<vmem>>, vector<2x32xf32>
    tpu.vector_store %arg23[%c14, %c0_140], %342 {strides = array<i32>} : memref<16x32xf32, #tpu.memory_space<vmem>>, vector<2x32xf32>,
    %c0_141 = arith.constant 0 : index
    %c0_142 = arith.constant 0 : index
    %344 = vector.load %arg21[%c0_141, %c0_142] : memref<2x32xf32, #tpu.memory_space<vmem>>, vector<2x32xf32>
    tpu.vector_store %arg21[%c0_141, %c0_142], %341 {strides = array<i32>} : memref<2x32xf32, #tpu.memory_space<vmem>>, vector<2x32xf32>,
    %c0_143 = arith.constant 0 : index
    %c0_144 = arith.constant 0 : index
    %345 = vector.load %arg22[%c0_143, %c0_144] : memref<2x32xf32, #tpu.memory_space<vmem>>, vector<2x32xf32>
    tpu.vector_store %arg22[%c0_143, %c0_144], %339 {strides = array<i32>} : memref<2x32xf32, #tpu.memory_space<vmem>>, vector<2x32xf32>,
    %c0_145 = arith.constant 0 : index
    %c0_146 = arith.constant 0 : index
    %346 = vector.load %arg15[%c0_145, %c0_146] : memref<32x32xf32, #tpu.memory_space<vmem>>, vector<32x32xf32>
    %cst_147 = arith.constant dense<0.000000e+00> : vector<16x32xf32>
    %347 = tpu.matmul %11, %346, %cst_147 {dimension_numbers = #tpu.dot_dimension_numbers<[1], [0], [0], [1], [0, 0, 1, 1], [], []>} : vector<16x32xf32>, vector<32x32xf32>, vector<16x32xf32> -> vector<16x32xf32>
    %c0_148 = arith.constant 0 : index
    %c0_149 = arith.constant 0 : index
    %348 = vector.load %arg23[%c0_148, %c0_149] : memref<16x32xf32, #tpu.memory_space<vmem>>, vector<16x32xf32>
    %349 = arith.addf %347, %348 : vector<16x32xf32>
    %c0_150 = arith.constant 0 : index
    %c0_151 = arith.constant 0 : index
    %350 = vector.load %arg17[%c0_150, %c0_151] : memref<1x32xf32, #tpu.memory_space<vmem>>, vector<1x32xf32>
    %351 = vector.broadcast %350 : vector<1x32xf32> to vector<16x32xf32>
    %352 = arith.addf %349, %351 : vector<16x32xf32>
    %cst_152 = arith.constant 0.000000e+00 : f32
    %353 = vector.broadcast %cst_152 : f32 to vector<16x32xf32>
    %354 = arith.maximumf %352, %353 : vector<16x32xf32>
    %c0_153 = arith.constant 0 : index
    %c0_154 = arith.constant 0 : index
    %355 = vector.load %arg18[%c0_153, %c0_154] : memref<32x1xf32, #tpu.memory_space<vmem>>, vector<32x1xf32>
    %cst_155 = arith.constant dense<0.000000e+00> : vector<16x1xf32>
    %356 = tpu.matmul %354, %355, %cst_155 {dimension_numbers = #tpu.dot_dimension_numbers<[1], [0], [0], [1], [0, 0, 1, 1], [], []>} : vector<16x32xf32>, vector<32x1xf32>, vector<16x1xf32> -> vector<16x1xf32>
    %c0_156 = arith.constant 0 : index
    %c0_157 = arith.constant 0 : index
    %357 = vector.load %arg19[%c0_156, %c0_157] : memref<1x1xf32, #tpu.memory_space<vmem>>, vector<1x1xf32>
    %358 = vector.broadcast %357 : vector<1x1xf32> to vector<16x1xf32>
    %359 = arith.addf %356, %358 : vector<16x1xf32>
    %c0_158 = arith.constant 0 : index
    %c0_159 = arith.constant 0 : index
    %360 = vector.load %arg20[%c0_158, %c0_159] : memref<16x1xf32, #tpu.memory_space<vmem>>, vector<16x1xf32>
    tpu.vector_store %arg20[%c0_158, %c0_159], %359 {strides = array<i32>} : memref<16x1xf32, #tpu.memory_space<vmem>>, vector<16x1xf32>,
    return
  }
  func.func @transform_0(%arg0: i32) -> (i32, i32) {
    %c0_i32 = arith.constant 0 : i32
    %c0_i32_0 = arith.constant 0 : i32
    %c0_i32_1 = arith.constant 0 : i32
    return %c0_i32, %c0_i32_0 : i32, i32
  }
  func.func @transform_1(%arg0: i32) -> (i32, i32) {
    %c0_i32 = arith.constant 0 : i32
    %c0_i32_0 = arith.constant 0 : i32
    %c0_i32_1 = arith.constant 0 : i32
    return %c0_i32, %c0_i32_0 : i32, i32
  }
  func.func @transform_2(%arg0: i32) -> (i32, i32) {
    %c0_i32 = arith.constant 0 : i32
    %c0_i32_0 = arith.constant 0 : i32
    %c0_i32_1 = arith.constant 0 : i32
    return %c0_i32, %c0_i32_0 : i32, i32
  }
  func.func @transform_3(%arg0: i32) -> (i32, i32, i32) {
    %c0_i32 = arith.constant 0 : i32
    %c0_i32_0 = arith.constant 0 : i32
    %c0_i32_1 = arith.constant 0 : i32
    %c0_i32_2 = arith.constant 0 : i32
    return %c0_i32, %c0_i32_0, %c0_i32_1 : i32, i32, i32
  }
  func.func @transform_4(%arg0: i32) -> (i32, i32, i32) {
    %c0_i32 = arith.constant 0 : i32
    %c0_i32_0 = arith.constant 0 : i32
    %c0_i32_1 = arith.constant 0 : i32
    %c0_i32_2 = arith.constant 0 : i32
    return %c0_i32, %c0_i32_0, %c0_i32_1 : i32, i32, i32
  }
  func.func @transform_5(%arg0: i32) -> (i32, i32) {
    %c0_i32 = arith.constant 0 : i32
    %c0_i32_0 = arith.constant 0 : i32
    %c0_i32_1 = arith.constant 0 : i32
    return %c0_i32, %c0_i32_0 : i32, i32
  }
  func.func @transform_6(%arg0: i32) -> (i32, i32) {
    %c0_i32 = arith.constant 0 : i32
    %c0_i32_0 = arith.constant 0 : i32
    %c0_i32_1 = arith.constant 0 : i32
    return %c0_i32, %c0_i32_0 : i32, i32
  }
  func.func @transform_7(%arg0: i32) -> (i32, i32) {
    %c0_i32 = arith.constant 0 : i32
    %c0_i32_0 = arith.constant 0 : i32
    %c0_i32_1 = arith.constant 0 : i32
    return %c0_i32, %c0_i32_0 : i32, i32
  }
  func.func @transform_8(%arg0: i32) -> (i32, i32) {
    %c0_i32 = arith.constant 0 : i32
    %c0_i32_0 = arith.constant 0 : i32
    %c0_i32_1 = arith.constant 0 : i32
    return %c0_i32, %c0_i32_0 : i32, i32
  }
  func.func @transform_9(%arg0: i32) -> (i32, i32) {
    %c0_i32 = arith.constant 0 : i32
    %c0_i32_0 = arith.constant 0 : i32
    %c0_i32_1 = arith.constant 0 : i32
    return %c0_i32, %c0_i32_0 : i32, i32
  }
  func.func @transform_10(%arg0: i32) -> (i32, i32) {
    %c0_i32 = arith.constant 0 : i32
    %c0_i32_0 = arith.constant 0 : i32
    %c0_i32_1 = arith.constant 0 : i32
    return %c0_i32, %c0_i32_0 : i32, i32
  }
  func.func @transform_11(%arg0: i32) -> (i32, i32, i32) {
    %c0_i32 = arith.constant 0 : i32
    %c0_i32_0 = arith.constant 0 : i32
    %c0_i32_1 = arith.constant 0 : i32
    %c0_i32_2 = arith.constant 0 : i32
    return %c0_i32, %c0_i32_0, %c0_i32_1 : i32, i32, i32
  }
  func.func @transform_12(%arg0: i32) -> (i32, i32, i32) {
    %c0_i32 = arith.constant 0 : i32
    %c0_i32_0 = arith.constant 0 : i32
    %c0_i32_1 = arith.constant 0 : i32
    %c0_i32_2 = arith.constant 0 : i32
    return %c0_i32, %c0_i32_0, %c0_i32_1 : i32, i32, i32
  }
  func.func @transform_13(%arg0: i32) -> (i32, i32, i32) {
    %c0_i32 = arith.constant 0 : i32
    %c0_i32_0 = arith.constant 0 : i32
    %c0_i32_1 = arith.constant 0 : i32
    %c0_i32_2 = arith.constant 0 : i32
    return %c0_i32, %c0_i32_0, %c0_i32_1 : i32, i32, i32
  }
  func.func @transform_14(%arg0: i32) -> (i32, i32) {
    %c0_i32 = arith.constant 0 : i32
    %c0_i32_0 = arith.constant 0 : i32
    %c0_i32_1 = arith.constant 0 : i32
    return %c0_i32, %c0_i32_0 : i32, i32
  }
  func.func @transform_15(%arg0: i32) -> (i32, i32) {
    %c0_i32 = arith.constant 0 : i32
    %c0_i32_0 = arith.constant 0 : i32
    %c0_i32_1 = arith.constant 0 : i32
    return %c0_i32, %c0_i32_0 : i32, i32
  }
  func.func @transform_16(%arg0: i32) -> (i32, i32) {
    %c0_i32 = arith.constant 0 : i32
    %c0_i32_0 = arith.constant 0 : i32
    %c0_i32_1 = arith.constant 0 : i32
    return %c0_i32, %c0_i32_0 : i32, i32
  }
  func.func @transform_17(%arg0: i32) -> (i32, i32) {
    %c0_i32 = arith.constant 0 : i32
    %c0_i32_0 = arith.constant 0 : i32
    %c0_i32_1 = arith.constant 0 : i32
    return %c0_i32, %c0_i32_0 : i32, i32
  }
  func.func @transform_18(%arg0: i32) -> (i32, i32) {
    %c0_i32 = arith.constant 0 : i32
    %c0_i32_0 = arith.constant 0 : i32
    %c0_i32_1 = arith.constant 0 : i32
    return %c0_i32, %c0_i32_0 : i32, i32
  }
  func.func @transform_19(%arg0: i32) -> (i32, i32) {
    %c0_i32 = arith.constant 0 : i32
    %c0_i32_0 = arith.constant 0 : i32
    %c0_i32_1 = arith.constant 0 : i32
    return %c0_i32, %c0_i32_0 : i32, i32
  }
  func.func @transform_20(%arg0: i32) -> (i32, i32) {
    %c0_i32 = arith.constant 0 : i32
    %c0_i32_0 = arith.constant 0 : i32
    %c0_i32_1 = arith.constant 0 : i32
    return %c0_i32, %c0_i32_0 : i32, i32
  }
  func.func @transform_21(%arg0: i32) -> (i32, i32) {
    %c0_i32 = arith.constant 0 : i32
    %c0_i32_0 = arith.constant 0 : i32
    %c0_i32_1 = arith.constant 0 : i32
    return %c0_i32, %c0_i32_0 : i32, i32
  }
}

</mosaic_0001>

<bundles_post_ra>
// kernel: qnetwork_lstm_forward.1
= control target key start
LH: loop header
LB: loop body
LE: loop exit
PB: predicated region body
PF: predicated region fallthrough
CT: control target
= control target key end

     0   :  { %s3094_s0 = inlined_call_operand.vmem [shape: f32[16,16], index: 0, kind: input, shape index: {}]   ;;  %s3095_s1 = inlined_call_operand.vmem [shape: f32[16,4], index: 1, kind: input, shape index: {}]   ;;  %s3096_s2 = inlined_call_operand.vmem [shape: f32[16,4], index: 2, kind: input, shape index: {}]   ;;  %s3097_s3 = inlined_call_operand.vmem [shape: f32[1,2,32], index: 3, kind: input, shape index: {}]   ;;  %s3098_s4 = inlined_call_operand.vmem [shape: f32[1,2,32], index: 4, kind: input, shape index: {}]   ;;  %s3099_s5 = inlined_call_operand.vmem [shape: f32[16,32], index: 5, kind: input, shape index: {}]   ;;  %s3100_s6 = inlined_call_operand.vmem [shape: f32[4,32], index: 6, kind: input, shape index: {}]   ;;  %s3101_s7 = inlined_call_operand.vmem [shape: f32[1,32], index: 7, kind: input, shape index: {}]   ;;  %s3102_s8 = inlined_call_operand.vmem [shape: f32[16,32], index: 8, kind: input, shape index: {}]   ;;  %s3103_s9 = inlined_call_operand.vmem [shape: f32[4,32], index: 9, kind: input, shape index: {}]   ;;  %s3104_s10 = inlined_call_operand.vmem [shape: f32[1,32], index: 10, kind: input, shape index: {}]   ;;  %s3105_s11 = inlined_call_operand.vmem [shape: f32[4,32,32], index: 11, kind: input, shape index: {}]   ;;  %s3106_s12 = inlined_call_operand.vmem [shape: f32[4,32,32], index: 12, kind: input, shape index: {}]   ;;  %s3107_s13 = inlined_call_operand.vmem [shape: f32[4,1,32], index: 13, kind: input, shape index: {}]   ;;  %s3108_s14 = inlined_call_operand.vmem [shape: f32[32,32], index: 14, kind: input, shape index: {}]   ;;  %s3109_s15 = inlined_call_operand.vmem [shape: f32[32,32], index: 15, kind: input, shape index: {}]   ;;  %s3110_s16 = inlined_call_operand.vmem [shape: f32[1,32], index: 16, kind: input, shape index: {}]   ;;  %s3111_s17 = inlined_call_operand.vmem [shape: f32[32,1], index: 17, kind: input, shape index: {}]   ;;  %s3112_s18 = inlined_call_operand.<no memory space> [shape: f32[1,1], index: 18, kind: input, shape index: {}]   ;;  %s3113_s19 = inlined_call_operand.vmem [shape: f32[16,1], index: 19, kind: output, shape index: {0}]   ;;  %s3114_s20 = inlined_call_operand.hbm [shape: f32[2,32], index: 20, kind: output, shape index: {1}]   ;;  %s3115_s21 = inlined_call_operand.hbm [shape: f32[2,32], index: 21, kind: output, shape index: {2}]  }
   0x1   :  { %3120 = sst [smem:[#allocation10_spill]] %s3094_s0  ;;  %v27_v0 = vstv %s3112_s18 }
   0x2   :  { %3121 = sst [smem:[#allocation11_spill]] %s3095_s1  ;;  %28 = vst [vmem:[#allocation3] sm:$0x1] %v27_v0 }
   0x3   :  { %3122 = sst [smem:[#allocation12_spill]] %s3096_s2 }
   0x4   :  { %3123 = sst [smem:[#allocation13_spill]] %s3097_s3 }
   0x5   :  { %3124 = sst [smem:[#allocation14_spill]] %s3098_s4 }
   0x6   :  { %3125 = sst [smem:[#allocation15_spill]] %s3099_s5 }
   0x7   :  { %29 = vsyncpa [#allocation5], 0  ;;  %vm83_vm0 = vcmask 1043456   ;;  %v152_v1 = vld [vmem:[%s3103_s9] sm:$0xf]  ;;  %vm76_vm1 = vcmask 31744  }
   0x8   :  { %s3126_s29 = sld [smem:[#allocation12_spill]]  ;;  %v149_v3 = vld [vmem:[%s3102_s8 + $0x8] sm:$0xff]  ;;  %2085 = vmatpush.msk.msra.mxu3 %vm83_vm0, %v152_v1  ;;  %1976 = vmatpush.msk.msra.mxu2 %vm83_vm0, %v152_v1  ;;  %v148_v5 = vld [vmem:[%s3102_s8] sm:$0xff] }
   0x9   :  { %v75_v6 = vld [vmem:[%s3100_s6] sm:$0xf]  ;;  %s3127_s2 = sld [smem:[#allocation11_spill]] }
   0xa   :  { %199 = vmatpush.msrb.mxu3 %v149_v3  ;;  %2084 = vmatpush.msk.msra.mxu1 %vm83_vm0, %v75_v6  ;;  %s3128_s27 = sld [smem:[#allocation15_spill]] }
   0xb   :  { %1971 = vmatpush.msk.msra.mxu0 %vm83_vm0, %v75_v6 }
   0xc   :  { %200 = vmatpush.msrb.mxu3 %v148_v5 }
   0xe   :  { %v151_v2 = vld [vmem:[%s3126_s29 + $0x8] sm:$0xff]  ;;  %v150_v4 = vld [vmem:[%s3126_s29] sm:$0xff] }
   0xf   :  { %1978 = vmatmul.msk.f32.vlgmr.msra.gmra.mxu3 %vm76_vm1, %v151_v2  ;;  %1977 = vmatmul.msk.f32.vlgmr.msra.gmra.mxu2 %vm76_vm1, %v150_v4  ;;  %v74_v7 = vld [vmem:[%s3127_s2 + $0x8] sm:$0xff] }
  0x10   :  { %v72_v8 = vld [vmem:[%s3128_s27 + $0x8] sm:$0xff]  ;;  %v71_v9 = vld [vmem:[%s3128_s27] sm:$0xff]  ;;  %1973 = vmatmul.msk.f32.vlgmr.msra.gmra.mxu1 %vm76_vm1, %v74_v7 }
  0x11   :  { %131 = vmatpush.msrb.mxu1 %v72_v8 }
  0x12   :  { %30 = vsyncpa [#allocation7], 0  ;;  %s3129_s29 = sld [smem:[#allocation10_spill]]  ;;  %vm110_vm2 = vcmask 130048   ;;  %v73_v12 = vld [vmem:[%s3127_s2] sm:$0xff]  ;;  %v1986_v13 = vld [vmem:[%s3105_s11 + $0x38] sm:$0xff] }
  0x13   :  { %132 = vmatpush.msrb.mxu1 %v71_v9  ;;  %1972 = vmatmul.msk.f32.vlgmr.msra.gmra.mxu0 %vm76_vm1, %v73_v12  ;;  %v219_v14 = vld [vmem:[%s3105_s11 + $0x18] sm:$0xff]  ;;  %v1985_v17 = vld [vmem:[%s3105_s11 + $0x30] sm:$0xff]  ;;  %v1984_v21 = vld [vmem:[%s3105_s11 + $0x28] sm:$0xff]  ;;  %vm224_vm3 = vcmask 261120   ;;  %s3130_s2 = sld [smem:[#allocation13_spill]]  ;;  %vm551_vm0 = vcmask 254976  }
  0x14   :  { %276 = vmatpush.msrb.mxu2 %v1986_v13  ;;  %v1993_v15 = vld [vmem:[%s3105_s11 + $0x58] sm:$0xff]  ;;  %243 = vmatpush.msrb.mxu0 %v219_v14  ;;  %v218_v18 = vld [vmem:[%s3105_s11 + $0x10] sm:$0xff]  ;;  %v217_v22 = vld [vmem:[%s3105_s11 + $0x8] sm:$0xff]  ;;  %s3131_s25 = sld [smem:[#allocation14_spill]]  ;;  %s2296_s30 = smov [#allocation4]  }
  0x15   :  { %v2000_v16 = vld [vmem:[%s3105_s11 + $0x78] sm:$0xff]  ;;  %309 = vmatpush.msra.mxu1 %v1993_v15  ;;  %v1992_v19 = vld [vmem:[%s3105_s11 + $0x50] sm:$0xff]  ;;  %v1991_v23 = vld [vmem:[%s3105_s11 + $0x48] sm:$0xff]  ;;  %s1944_s5 = sshll.u32 %s3114_s20, 4  ;;  %s2297_s22 = smov [#allocation6]   ;;  %s1945_s5 = int_to_ptr.hbm [resolvable:$true] %s1944_s5 }
  0x16   :  { %342 = vmatpush.msra.mxu3 %v2000_v16  ;;  %277 = vmatpush.msrb.mxu2 %v1985_v17  ;;  %v1999_v20 = vld [vmem:[%s3105_s11 + $0x70] sm:$0xff]  ;;  %v1998_v24 = vld [vmem:[%s3105_s11 + $0x68] sm:$0xff]  ;;  %v1983_v25 = vld [vmem:[%s3105_s11 + $0x20] sm:$0xff]  ;;  %s1955_s1 = sshll.u32 %s3115_s21, 4  ;;  %s1956_s1 = int_to_ptr.hbm [resolvable:$true] %s1955_s1 }
  0x17   :  { %244 = vmatpush.msrb.mxu0 %v218_v18  ;;  %310 = vmatpush.msra.mxu1 %v1992_v19  ;;  %v216_v26 = vld [vmem:[%s3105_s11] sm:$0xff]  ;;  %v2506_v29 = vld [vmem:[%s3106_s12 + $0x38] sm:$0xff]  ;;  %v2512_v30 = vld [vmem:[%s3106_s12 + $0x30] sm:$0xff] }
  0x18   :  { %v69_v10 = vld [vmem:[%s3129_s29] sm:$0xff]  ;;  %v70_v11 = vld [vmem:[%s3129_s29 + $0x8] sm:$0xff]  ;;  %343 = vmatpush.msra.mxu3 %v1999_v20  ;;  %278 = vmatpush.msrb.mxu2 %v1984_v21  ;;  %v2517_v31 = vld [vmem:[%s3106_s12 + $0x18] sm:$0xff] }
  0x19   :  { %1979 = vmatmul.msk.f32.vlgmr.msrb.gmra.mxu3 %vm110_vm2, %v69_v10  ;;  %1974 = vmatmul.msk.f32.vlgmr.msrb.gmra.mxu1 %vm110_vm2, %v69_v10  ;;  %v1990_v27 = vld [vmem:[%s3105_s11 + $0x40] sm:$0xff]  ;;  %v2524_v32 = vld [vmem:[%s3106_s12 + $0x28] sm:$0xff]  ;;  %v2529_v33 = vld [vmem:[%s3106_s12 + $0x58] sm:$0xff] }
  0x1a   :  { %245 = vmatpush.msrb.mxu0 %v217_v22  ;;  %311 = vmatpush.msra.mxu1 %v1991_v23  ;;  %v1997_v28 = vld [vmem:[%s3105_s11 + $0x60] sm:$0xff]  ;;  %v2534_v34 = vld [vmem:[%s3106_s12 + $0x78] sm:$0xff]  ;;  %v2541_v35 = vld [vmem:[%s3106_s12 + $0x10] sm:$0xff] }
  0x1b   :  { %344 = vmatpush.msra.mxu3 %v1998_v24  ;;  %279 = vmatpush.msrb.mxu2 %v1983_v25  ;;  %v2546_v36 = vld [vmem:[%s3106_s12 + $0x50] sm:$0xff]  ;;  %v2558_v38 = vld [vmem:[%s3106_s12 + $0x20] sm:$0xff]  ;;  %v2563_v39 = vld [vmem:[%s3106_s12 + $0x8] sm:$0xff] }
  0x1c   :  { %246 = vmatpush.msrb.mxu0 %v216_v26  ;;  %312 = vmatpush.msra.mxu1 %v1990_v27  ;;  %v2551_v37 = vld [vmem:[%s3106_s12 + $0x70] sm:$0xff]  ;;  %v2568_v40 = vld [vmem:[%s3106_s12 + $0x48] sm:$0xff]  ;;  %v2580_v42 = vld [vmem:[%s3106_s12] sm:$0xff] }
  0x1d   :  { %345 = vmatpush.msra.mxu3 %v1997_v28  ;;  %414 = vmatpush.msra.mxu2 %v2506_v29  ;;  %v2575_v41 = vld [vmem:[%s3106_s12 + $0x68] sm:$0xff]  ;;  %v2587_v43 = vld [vmem:[%s3106_s12 + $0x40] sm:$0xff]  ;;  %v2671_v19 = vld [vmem:[%s3109_s15 + $0x18] sm:$0xff] }
  0x1e   :  { %393 = vmatpush.msra.mxu0 %v2517_v31  ;;  %435 = vmatpush.msrb.mxu1 %v2529_v33  ;;  %v2593_v44 = vld [vmem:[%s3106_s12 + $0x60] sm:$0xff]  ;;  %v2676_v20 = vld [vmem:[%s3109_s15 + $0x10] sm:$0xff]  ;;  %v2686_v25 = vld [vmem:[%s3109_s15 + $0x8] sm:$0xff] }
  0x1f   :  { %415 = vmatpush.msra.mxu2 %v2512_v30  ;;  %456 = vmatpush.msrb.mxu3 %v2534_v34  ;;  %v2088_v47 = vld [vmem:[%s3104_s10] ss:$0 sm:$0xff]  ;;  %v2091_v3 = vld [vmem:[%s3107_s13 + $0x2] ss:$0 sm:$0xff]  ;;  %v2092_v8 = vld [vmem:[%s3107_s13 + $0x1] ss:$0 sm:$0xff] }
  0x20   :  { %394 = vmatpush.msra.mxu0 %v2541_v35  ;;  %436 = vmatpush.msrb.mxu1 %v2546_v36  ;;  %v376_v56 = vld [vmem:[%s3130_s2] sm:$0x3]  ;;  %v2093_v9 = vld [vmem:[%s3107_s13 + $0x3] ss:$0 sm:$0xff] }
  0x21   :  { %1980 = vmatmul.msk.f32.gmra.mxu3 %vm110_vm2, %v70_v11  ;;  %1975 = vmatmul.msk.f32.gmra.mxu1 %vm110_vm2, %v70_v11  ;;  %v2090_v1 = vld [vmem:[%s3107_s13] ss:$0 sm:$0xff]  ;;  %s1942_s13 = sshll.u32 %s2296_s30, 4  ;;  %s1943_s13 = int_to_ptr.vmem [resolvable:$true] %s1942_s13 }
  0x22   :  { %416 = vmatpush.msra.mxu2 %v2524_v32  ;;  %457 = vmatpush.msrb.mxu3 %v2551_v37  ;;  %v2694_v28 = vld [vmem:[%s3109_s15] sm:$0xff] }
  0x23   :  { %395 = vmatpush.msra.mxu0 %v2563_v39  ;;  %437 = vmatpush.msrb.mxu1 %v2568_v40 }
  0x24   :  { %417 = vmatpush.msra.mxu2 %v2558_v38  ;;  %458 = vmatpush.msrb.mxu3 %v2575_v41 }
  0x25   :  { %396 = vmatpush.msra.mxu0 %v2580_v42  ;;  %438 = vmatpush.msrb.mxu1 %v2587_v43 }
  0x26   :  { %459 = vmatpush.msrb.mxu3 %v2593_v44 }
  0x8d   :  { %v2637_v57 = vpop.f32.mrf.mxu1 }
  0x90   :  { %v104_v59 = vpop.f32.mrf.mxu0 }
  0x92   :  { %v182_v45 = vpop.f32.mrf.mxu3  ;;  %v179_v46 = vpop.f32.mrf.mxu2 }
  0x96   :  { %v134_v58 = vpop.f32.mrf.mxu1 }
  0x97   :  { %v2639_v60 = vadd.f32 %v134_v58, %v104_v59 }
  0x9c   :  { %v202_v48 = vpop.f32.mrf.mxu3 }
  0x9d   :  { %v203_v49 = vadd.f32 %v202_v48, %v179_v46 }
  0x9e   :  { %v2641_v61 = vpop.f32.mrf.mxu1 }
  0x9f   :  { %v212_v50 = vadd.f32 %v2088_v47, %v203_v49 }
  0xa1   :  { %v214_v51 = vmax.f32 %v212_v50, 0.0 }
  0xa3   :  { %1981 = vmatmul.msk.f32.vlgmr.msrb.gmra.mxu0 %vm224_vm3, %v214_v51  ;;  %1988 = vmatmul.msk.f32.vlgmr.msrb.gmra.mxu2 %vm224_vm3, %v214_v51 }
  0xa4   :  { %1995 = vmatmul.msk.f32.vlgmr.msra.gmra.mxu1 %vm224_vm3, %v214_v51  ;;  %2002 = vmatmul.msk.f32.vlgmr.msra.gmra.mxu3 %vm224_vm3, %v214_v51  ;;  %v205_v52 = vpop.f32.mrf.mxu3 }
  0xa5   :  { %v206_v53 = vadd.f32 %v205_v52, %v182_v45  ;;  %565 = vmatpush.msrb.mxu2 %v2517_v31  ;;  %589 = vmatpush.msra.mxu1 %v2506_v29 }
  0xa6   :  { %613 = vmatpush.msra.mxu3 %v2529_v33  ;;  %543 = vmatpush.msrb.mxu0 %v2671_v19 }
  0xa7   :  { %v213_v54 = vadd.f32 %v2088_v47, %v206_v53  ;;  %566 = vmatpush.msrb.mxu2 %v2541_v35  ;;  %590 = vmatpush.msra.mxu1 %v2512_v30 }
  0xa8   :  { %614 = vmatpush.msra.mxu3 %v2546_v36  ;;  %544 = vmatpush.msrb.mxu0 %v2676_v20 }
  0xa9   :  { %v215_v55 = vmax.f32 %v213_v54, 0.0  ;;  %567 = vmatpush.msrb.mxu2 %v2563_v39  ;;  %591 = vmatpush.msra.mxu1 %v2524_v32 }
  0xaa   :  { %615 = vmatpush.msra.mxu3 %v2568_v40  ;;  %545 = vmatpush.msrb.mxu0 %v2686_v25 }
  0xab   :  { %1982 = vmatmul.msk.f32.gmra.mxu0 %vm224_vm3, %v215_v55  ;;  %1989 = vmatmul.msk.f32.gmra.mxu2 %vm224_vm3, %v215_v55 }
  0xac   :  { %1996 = vmatmul.msk.f32.gmra.mxu1 %vm224_vm3, %v215_v55  ;;  %2003 = vmatmul.msk.f32.gmra.mxu3 %vm224_vm3, %v215_v55 }
  0xad   :  { %568 = vmatpush.msrb.mxu2 %v2580_v42  ;;  %592 = vmatpush.msra.mxu1 %v2558_v38 }
  0xae   :  { %616 = vmatpush.msra.mxu3 %v2587_v43  ;;  %546 = vmatpush.msrb.mxu0 %v2694_v28 }
  0xb3   :  { %2016 = vmatmul.msk.f32.vlgmr.msra.gmra.mxu0 %vm224_vm3, %v376_v56  ;;  %2017 = vmatmul.msk.f32.vlgmr.msra.gmra.mxu2 %vm224_vm3, %v376_v56 }
  0xb4   :  { %2018 = vmatmul.msk.f32.vlgmr.msrb.gmra.mxu1 %vm224_vm3, %v376_v56  ;;  %2019 = vmatmul.msk.f32.vlgmr.msrb.gmra.mxu3 %vm224_vm3, %v376_v56 }
  0xb5   :  { %776 = vmatpush.msrb.mxu3 %v2506_v29  ;;  %752 = vmatpush.msrb.mxu1 %v2517_v31 }
  0xb6   :  { %731 = vmatpush.msra.mxu2 %v2671_v19  ;;  %637 = vmatpush.msra.mxu0 %v2534_v34 }
  0xb7   :  { %777 = vmatpush.msrb.mxu3 %v2512_v30  ;;  %753 = vmatpush.msrb.mxu1 %v2541_v35 }
  0xb8   :  { %732 = vmatpush.msra.mxu2 %v2676_v20  ;;  %638 = vmatpush.msra.mxu0 %v2551_v37 }
  0xb9   :  { %778 = vmatpush.msrb.mxu3 %v2524_v32  ;;  %754 = vmatpush.msrb.mxu1 %v2563_v39 }
  0xba   :  { %733 = vmatpush.msra.mxu2 %v2686_v25  ;;  %639 = vmatpush.msra.mxu0 %v2575_v41 }
  0xbb   :  { %779 = vmatpush.msrb.mxu3 %v2558_v38  ;;  %755 = vmatpush.msrb.mxu1 %v2580_v42 }
  0xbc   :  { %734 = vmatpush.msra.mxu2 %v2694_v28  ;;  %640 = vmatpush.msra.mxu0 %v2593_v44 }
 0x120   :  { %v248_v62 = vpop.f32.mrf.mxu0 }
 0x121   :  { %v314_v63 = vpop.f32.mrf.mxu1  ;;  %v2659_v11 = vadd.f32 %v2090_v1, %v248_v62 }
 0x122   :  { %v2704_v56 = vadd.f32 %v2091_v3, %v314_v63 }
 0x126   :  { %v281_v0 = vpop.f32.mrf.mxu2 }
 0x127   :  { %v347_v2 = vpop.f32.mrf.mxu3  ;;  %v2666_v18 = vadd.f32 %v2092_v8, %v281_v0 }
 0x128   :  { %v251_v4 = vpop.f32.mrf.mxu0  ;;  %v2678_v21 = vadd.f32 %v2093_v9, %v347_v2 }
 0x129   :  { %v2649_v5 = vadd.f32 %v2090_v1, %v251_v4  ;;  %v317_v6 = vpop.f32.mrf.mxu1 }
 0x12a   :  { %v2651_v7 = vadd.f32 %v2091_v3, %v317_v6 }
 0x12e   :  { %v284_v10 = vpop.f32.mrf.mxu2 }
 0x12f   :  { %v2661_v12 = vadd.f32 %v2092_v8, %v284_v10  ;;  %v350_v13 = vpop.f32.mrf.mxu3 }
 0x130   :  { %v2663_v14 = vadd.f32 %v2093_v9, %v350_v13  ;;  %v398_v15 = vpop.f32.mrf.mxu0 }
 0x131   :  { %v401_v16 = vadd.f32 %v398_v15, %v2659_v11  ;;  %v440_v55 = vpop.f32.mrf.mxu1 }
 0x132   :  { %v443_v62 = vadd.f32 %v440_v55, %v2704_v56 }
 0x133   :  { %v2020_v17 = vmul.f32 -1.442695, %v401_v16 }
 0x135   :  { %2096 = vpow2.f32 %v2020_v17 }
 0x136   :  { %v419_v22 = vpop.f32.mrf.mxu2 }
 0x137   :  { %v422_v23 = vadd.f32 %v419_v22, %v2666_v18  ;;  %v461_v24 = vpop.f32.mrf.mxu3 }
 0x138   :  { %v464_v26 = vadd.f32 %v461_v24, %v2678_v21 }
 0x139   :  { %v2021_v27 = vmul.f32 -1.442695, %v422_v23  ;;  %v377_v23 = vld [vmem:[%s3131_s25] sm:$0x3] }
 0x13a   :  { %v2022_v45 = vmul.f32 -1.442695, %v464_v26 }
 0x13b   :  { %v2097_v46 = vpop.eup %2096  ;;  %2098 = vpow2.f32 %v2021_v27 }
 0x13c   :  { %v468_v47 = vadd.f32 1.0, %v2097_v46  ;;  %2100 = vpow2.f32 %v2022_v45 }
 0x13e   :  { %2102 = vrcp.f32 %v468_v47  ;;  %v480_v4 = vand.u32 2147483648, %v468_v47  ;;  %vm474_vm5 = vweird.f32 %v468_v47  ;;  %v478_v8 = vand.u32 2147483647, %v468_v47 }
 0x140   :  { %v481_v3 = vor.u32 1.1754944e-38, %v480_v4  ;;  %vm479_vm8 = vcmp.eq.f32.partialorder %v478_v8, 8.507059e+37 }
 0x141   :  { %v2099_v48 = vpop.eup %2098 }
 0x142   :  { %v2101_v49 = vpop.eup %2100  ;;  %v487_v50 = vadd.f32 1.0, %v2099_v48 }
 0x143   :  { %v507_v51 = vadd.f32 1.0, %v2101_v49 }
 0x144   :  { %v2103_v52 = vpop.eup %2102  ;;  %2104 = vrcp.f32 %v487_v50  ;;  %v499_v10 = vand.u32 2147483648, %v487_v50  ;;  %v497_v63 = vand.u32 2147483647, %v487_v50  ;;  %vm493_vm9 = vweird.f32 %v487_v50 }
 0x145   :  { %v470_v53 = vmul.f32 %v2103_v52, %v468_v47  ;;  %2106 = vrcp.f32 %v507_v51  ;;  %vm475_vm4 = vweird.f32 %v2103_v52  ;;  %vm513_vm13 = vweird.f32 %v507_v51 }
 0x146   :  { %vm476_vm6 = vmor %vm474_vm5, %vm475_vm4  ;;  %2108 = vtanh.f32 %v443_v62  ;;  %v500_v24 = vor.u32 1.1754944e-38, %v499_v10  ;;  %vm498_vm11 = vcmp.eq.f32.partialorder %v497_v63, 8.507059e+37 }
 0x147   :  { %v471_v54 = vsub.f32 1.0, %v470_v53  ;;  %v519_v53 = vand.u32 2147483648, %v507_v51 }
 0x149   :  { %v472_v58 = vmul.f32 %v2103_v52, %v471_v54  ;;  %v520_v55 = vor.u32 1.1754944e-38, %v519_v53 }
 0x14a   :  { %v2105_v59 = vpop.eup %2104 }
 0x14b   :  { %v2107_v0 = vpop.eup %2106  ;;  %v473_v1 = vadd.f32 %v2103_v52, %v472_v58  ;;  %v489_v2 = vmul.f32 %v2105_v59, %v487_v50  ;;  %vm494_vm7 = vweird.f32 %v2105_v59  ;;  %v517_v50 = vand.u32 2147483647, %v507_v51 }
 0x14c   :  { %v509_v6 = vmul.f32 %v2107_v0, %v507_v51  ;;  %vm495_vm10 = vmor %vm493_vm9, %vm494_vm7  ;;  %v2109_v27 = vpop.eup %2108  ;;  %vm514_vm12 = vweird.f32 %v2107_v0 }
 0x14d   :  { %v490_v9 = vsub.f32 1.0, %v489_v2  ;;  %v477_v13 = vsel %vm476_vm6, %v2103_v52, %v473_v1  ;;  %vm515_vm14 = vmor %vm513_vm13, %vm514_vm12  ;;  %vm518_vm15 = vcmp.eq.f32.partialorder %v517_v50, 8.507059e+37 }
 0x14e   :  { %v510_v16 = vsub.f32 1.0, %v509_v6  ;;  %v482_v22 = vsel %vm479_vm8, %v481_v3, %v477_v13 }
 0x14f   :  { %v491_v15 = vmul.f32 %v2105_v59, %v490_v9  ;;  %v524_v47 = vmul.f32 %v2109_v27, %v482_v22 }
 0x150   :  { %v511_v46 = vmul.f32 %v2107_v0, %v510_v16 }
 0x151   :  { %v492_v17 = vadd.f32 %v2105_v59, %v491_v15 }
 0x152   :  { %v512_v52 = vadd.f32 %v2107_v0, %v511_v46 }
 0x153   :  { %v496_v26 = vsel %vm495_vm10, %v2105_v59, %v492_v17 }
 0x154   :  { %v501_v45 = vsel %vm498_vm11, %v500_v24, %v496_v26  ;;  %v516_v54 = vsel %vm515_vm14, %v2107_v0, %v512_v52 }
 0x155   :  { %v523_v48 = vmul.f32 %v501_v45, %v377_v23  ;;  %v521_v59 = vsel %vm518_vm15, %v520_v55, %v516_v54 }
 0x157   :  { %v2710_v49 = vadd.f32 %v524_v47, %v523_v48 }
 0x159   :  { %2110 = vtanh.f32 %v2710_v49 }
 0x15f   :  { %v2111_v58 = vpop.eup %2110 }
 0x160   :  { %v527_v62 = vmul.f32 %v2111_v58, %v521_v59 }
 0x162   :  { %2023 = vmatmul.msk.f32.vlgmr.msrb.gmra.mxu0 %vm224_vm3, %v527_v62  ;;  %2024 = vmatmul.msk.f32.vlgmr.msrb.gmra.mxu2 %vm224_vm3, %v527_v62 }
 0x163   :  { %2025 = vmatmul.msk.f32.vlgmr.msra.gmra.mxu1 %vm224_vm3, %v527_v62  ;;  %2026 = vmatmul.msk.f32.vlgmr.msra.gmra.mxu3 %vm224_vm3, %v527_v62 }
 0x164   :  { %800 = vmatpush.msrb.mxu0 %v2529_v33  ;;  %824 = vmatpush.msrb.mxu2 %v2534_v34 }
 0x165   :  { %939 = vmatpush.msra.mxu3 %v2517_v31  ;;  %918 = vmatpush.msra.mxu1 %v2671_v19 }
 0x166   :  { %801 = vmatpush.msrb.mxu0 %v2546_v36  ;;  %825 = vmatpush.msrb.mxu2 %v2551_v37 }
 0x167   :  { %940 = vmatpush.msra.mxu3 %v2541_v35  ;;  %919 = vmatpush.msra.mxu1 %v2676_v20 }
 0x168   :  { %802 = vmatpush.msrb.mxu0 %v2568_v40  ;;  %826 = vmatpush.msrb.mxu2 %v2575_v41 }
 0x169   :  { %941 = vmatpush.msra.mxu3 %v2563_v39  ;;  %920 = vmatpush.msra.mxu1 %v2686_v25 }
 0x16a   :  { %2027 = vmatmul.msk.f32.vlgmr.msra.gmra.mxu0 %vm224_vm3, %v527_v62  ;;  %827 = vmatpush.msrb.mxu2 %v2593_v44 }
 0x16b   :  { %803 = vmatpush.msrb.mxu0 %v2587_v43  ;;  %942 = vmatpush.msra.mxu3 %v2580_v42 }
 0x16c   :  { %921 = vmatpush.msra.mxu1 %v2694_v28 }
 0x16d   :  { %963 = vmatpush.msra.mxu0 %v2506_v29 }
 0x16f   :  { %964 = vmatpush.msra.mxu0 %v2512_v30 }
 0x171   :  { %965 = vmatpush.msra.mxu0 %v2524_v32 }
 0x173   :  { %966 = vmatpush.msra.mxu0 %v2558_v38 }
 0x1df   :  { %v548_v51 = vpop.f32.mrf.mxu0 }
 0x1e0   :  { %552 = vst.msk [vmem:[#allocation2] sm:$0x3] %vm551_vm0, %v548_v51  ;;  %v594_v0 = vpop.f32.mrf.mxu1 }
 0x1e1   :  { %v598_v1 = vrot.slane %v594_v0, 6 }
 0x1e3   :  { %v600_v2 = vadd.f32 %v598_v1, %v2666_v18 }
 0x1e5   :  { %v2029_v4 = vmul.f32 -1.442695, %v600_v2  ;;  %v570_v6 = vpop.f32.mrf.mxu2 }
 0x1e6   :  { %v574_v8 = vrot.slane %v570_v6, 6  ;;  %v618_v26 = vpop.f32.mrf.mxu3 }
 0x1e7   :  { %2112 = vpow2.f32 %v2029_v4  ;;  %v642_v9 = vpop.f32.mrf.mxu0  ;;  %v622_v47 = vrot.slane %v618_v26, 6 }
 0x1e8   :  { %v576_v10 = vadd.f32 %v574_v8, %v2659_v11  ;;  %v646_v13 = vrot.slane %v642_v9, 6 }
 0x1e9   :  { %v624_v50 = vadd.f32 %v622_v47, %v2704_v56 }
 0x1ea   :  { %v2028_v15 = vmul.f32 -1.442695, %v576_v10  ;;  %v648_v63 = vadd.f32 %v646_v13, %v2678_v21 }
 0x1ec   :  { %2114 = vpow2.f32 %v2028_v15  ;;  %v2030_v3 = vmul.f32 -1.442695, %v648_v63 }
 0x1ed   :  { %v2113_v16 = vpop.eup %2112 }
 0x1ee   :  { %v671_v17 = vadd.f32 1.0, %v2113_v16  ;;  %2116 = vpow2.f32 %v2030_v3  ;;  %v708_v16 = vrot.slane %v2710_v49, 6 }
 0x1f0   :  { %2118 = vrcp.f32 %v671_v17  ;;  %v683_v55 = vand.u32 2147483648, %v671_v17  ;;  %vm677_vm2 = vweird.f32 %v671_v17  ;;  %v681_v51 = vand.u32 2147483647, %v671_v17 }
 0x1f2   :  { %v2115_v22 = vpop.eup %2114  ;;  %v684_v9 = vor.u32 1.1754944e-38, %v683_v55  ;;  %vm682_vm7 = vcmp.eq.f32.partialorder %v681_v51, 8.507059e+37 }
 0x1f3   :  { %v652_v23 = vadd.f32 1.0, %v2115_v22 }
 0x1f4   :  { %v2117_v24 = vpop.eup %2116 }
 0x1f5   :  { %2120 = vrcp.f32 %v652_v23  ;;  %v691_v45 = vadd.f32 1.0, %v2117_v24  ;;  %v664_v1 = vand.u32 2147483648, %v652_v23  ;;  %v662_v6 = vand.u32 2147483647, %v652_v23 }
 0x1f6   :  { %v2119_v27 = vpop.eup %2118  ;;  %vm658_vm6 = vweird.f32 %v652_v23 }
 0x1f7   :  { %v673_v46 = vmul.f32 %v2119_v27, %v671_v17  ;;  %2122 = vrcp.f32 %v691_v45  ;;  %vm678_vm1 = vweird.f32 %v2119_v27  ;;  %v665_v15 = vor.u32 1.1754944e-38, %v664_v1 }
 0x1f8   :  { %vm2743_vm4 = vmor %vm677_vm2, %vm678_vm1  ;;  %2124 = vtanh.f32 %v624_v50  ;;  %vm663_vm9 = vcmp.eq.f32.partialorder %v662_v6, 8.507059e+37  ;;  %vm697_vm11 = vweird.f32 %v691_v45 }
 0x1f9   :  { %v674_v48 = vsub.f32 1.0, %v673_v46 }
 0x1fb   :  { %v2121_v52 = vpop.eup %2120  ;;  %v675_v53 = vmul.f32 %v2119_v27, %v674_v48  ;;  %v701_v48 = vand.u32 2147483647, %v691_v45 }
 0x1fc   :  { %v654_v54 = vmul.f32 %v2121_v52, %v652_v23  ;;  %vm659_vm5 = vweird.f32 %v2121_v52  ;;  %v703_v23 = vand.u32 2147483648, %v691_v45 }
 0x1fd   :  { %v676_v58 = vadd.f32 %v2119_v27, %v675_v53  ;;  %v2123_v59 = vpop.eup %2122  ;;  %vm660_vm8 = vmor %vm658_vm6, %vm659_vm5  ;;  %vm702_vm13 = vcmp.eq.f32.partialorder %v701_v48, 8.507059e+37 }
 0x1fe   :  { %v655_v62 = vsub.f32 1.0, %v654_v54  ;;  %v693_v2 = vmul.f32 %v2123_v59, %v691_v45  ;;  %v2125_v17 = vpop.eup %2124  ;;  %vm698_vm10 = vweird.f32 %v2123_v59 }
 0x1ff   :  { %v680_v8 = vsel %vm2743_vm4, %v2119_v27, %v676_v58  ;;  %vm699_vm12 = vmor %vm697_vm11, %vm698_vm10 }
 0x200   :  { %v656_v4 = vmul.f32 %v2121_v52, %v655_v62  ;;  %v694_v10 = vsub.f32 1.0, %v693_v2  ;;  %v685_v63 = vsel %vm682_vm7, %v684_v9, %v680_v8 }
 0x201   :  { %v710_v26 = vmul.f32 %v708_v16, %v685_v63 }
 0x202   :  { %v657_v13 = vadd.f32 %v2121_v52, %v656_v4  ;;  %v695_v24 = vmul.f32 %v2123_v59, %v694_v10 }
 0x204   :  { %v661_v3 = vsel %vm660_vm8, %v2121_v52, %v657_v13  ;;  %v696_v27 = vadd.f32 %v2123_v59, %v695_v24  ;;  %v704_v52 = vor.u32 1.1754944e-38, %v703_v23 }
 0x205   :  { %v666_v22 = vsel %vm663_vm9, %v665_v15, %v661_v3 }
 0x206   :  { %v711_v46 = vmul.f32 %v2125_v17, %v666_v22  ;;  %v700_v53 = vsel %vm699_vm12, %v2123_v59, %v696_v27 }
 0x207   :  { %v705_v49 = vsel %vm702_vm13, %v704_v52, %v700_v53 }
 0x208   :  { %v2750_v47 = vadd.f32 %v711_v46, %v710_v26 }
 0x20a   :  { %2126 = vtanh.f32 %v2750_v47 }
 0x210   :  { %v2127_v50 = vpop.eup %2126 }
 0x211   :  { %v714_v54 = vmul.f32 %v2127_v50, %v705_v49 }
 0x213   :  { %v716_v55 = vrot.slane %v714_v54, 2 }
 0x215   :  { %2031 = vmatmul.msk.f32.vlgmr.msra.gmra.mxu2 %vm224_vm3, %v716_v55  ;;  %2032 = vmatmul.msk.f32.vlgmr.msrb.gmra.mxu1 %vm224_vm3, %v716_v55 }
 0x216   :  { %2033 = vmatmul.msk.f32.vlgmr.msrb.gmra.mxu3 %vm224_vm3, %v716_v55  ;;  %2034 = vmatmul.msk.f32.vlgmr.msrb.gmra.mxu0 %vm224_vm3, %v716_v55 }
 0x217   :  { %987 = vmatpush.msra.mxu2 %v2529_v33  ;;  %1011 = vmatpush.msrb.mxu1 %v2534_v34 }
 0x218   :  { %1105 = vmatpush.msrb.mxu3 %v2671_v19  ;;  %1126 = vmatpush.msrb.mxu0 %v2517_v31 }
 0x219   :  { %988 = vmatpush.msra.mxu2 %v2546_v36  ;;  %1012 = vmatpush.msrb.mxu1 %v2551_v37 }
 0x21a   :  { %1106 = vmatpush.msrb.mxu3 %v2676_v20  ;;  %1127 = vmatpush.msrb.mxu0 %v2541_v35 }
 0x21b   :  { %989 = vmatpush.msra.mxu2 %v2568_v40  ;;  %1013 = vmatpush.msrb.mxu1 %v2575_v41 }
 0x21c   :  { %1107 = vmatpush.msrb.mxu3 %v2686_v25  ;;  %1128 = vmatpush.msrb.mxu0 %v2563_v39 }
 0x21d   :  { %2035 = vmatmul.msk.f32.vlgmr.msrb.gmra.mxu2 %vm224_vm3, %v716_v55  ;;  %1014 = vmatpush.msrb.mxu1 %v2593_v44 }
 0x21e   :  { %990 = vmatpush.msra.mxu2 %v2587_v43  ;;  %1108 = vmatpush.msrb.mxu3 %v2694_v28 }
 0x21f   :  { %1129 = vmatpush.msrb.mxu0 %v2580_v42 }
 0x220   :  { %1147 = vmatpush.msrb.mxu2 %v2506_v29 }
 0x222   :  { %1148 = vmatpush.msrb.mxu2 %v2512_v30 }
 0x224   :  { %1149 = vmatpush.msrb.mxu2 %v2524_v32 }
 0x226   :  { %1150 = vmatpush.msrb.mxu2 %v2558_v38 }
 0x292   :  { %v757_v45 = vpop.f32.mrf.mxu1 }
 0x293   :  { %v761_v58 = vrot.slane %v757_v45, 4  ;;  %v805_v17 = vpop.f32.mrf.mxu0 }
 0x294   :  { %v809_v26 = vrot.slane %v805_v17, 4 }
 0x295   :  { %v763_v59 = vadd.f32 %v761_v58, %v2659_v11 }
 0x296   :  { %v811_v53 = vadd.f32 %v809_v26, %v2704_v56 }
 0x297   :  { %v2036_v62 = vmul.f32 -1.442695, %v763_v59 }
 0x298   :  { %v736_v51 = vpop.f32.mrf.mxu2 }
 0x299   :  { %2128 = vpow2.f32 %v2036_v62  ;;  %739 = vst.msk [vmem:[#allocation2 + $0x2] sm:$0x3] %vm551_vm0, %v736_v51  ;;  %v781_v0 = vpop.f32.mrf.mxu3 }
 0x29a   :  { %v785_v1 = vrot.slane %v781_v0, 4 }
 0x29c   :  { %v787_v2 = vadd.f32 %v785_v1, %v2666_v18 }
 0x29e   :  { %v2037_v4 = vmul.f32 -1.442695, %v787_v2 }
 0x29f   :  { %v2129_v6 = vpop.eup %2128 }
 0x2a0   :  { %v839_v8 = vadd.f32 1.0, %v2129_v6  ;;  %2130 = vpow2.f32 %v2037_v4  ;;  %v829_v9 = vpop.f32.mrf.mxu2 }
 0x2a1   :  { %v833_v10 = vrot.slane %v829_v9, 4  ;;  %v895_v9 = vrot.slane %v2750_v47, 6 }
 0x2a2   :  { %2132 = vrcp.f32 %v839_v8  ;;  %v851_v49 = vand.u32 2147483648, %v839_v8  ;;  %vm845_vm15 = vweird.f32 %v839_v8  ;;  %v849_v54 = vand.u32 2147483647, %v839_v8 }
 0x2a3   :  { %v835_v13 = vadd.f32 %v833_v10, %v2678_v21 }
 0x2a4   :  { %v852_v51 = vor.u32 1.1754944e-38, %v851_v49  ;;  %vm850_vm4 = vcmp.eq.f32.partialorder %v849_v54, 8.507059e+37 }
 0x2a5   :  { %v2038_v15 = vmul.f32 -1.442695, %v835_v13 }
 0x2a6   :  { %v2131_v63 = vpop.eup %2130 }
 0x2a7   :  { %v858_v3 = vadd.f32 1.0, %v2131_v63  ;;  %2134 = vpow2.f32 %v2038_v15 }
 0x2a8   :  { %v2133_v16 = vpop.eup %2132 }
 0x2a9   :  { %v841_v22 = vmul.f32 %v2133_v16, %v839_v8  ;;  %2136 = vrcp.f32 %v858_v3  ;;  %vm846_vm14 = vweird.f32 %v2133_v16  ;;  %v870_v45 = vand.u32 2147483648, %v858_v3 }
 0x2aa   :  { %vm847_vm1 = vmor %vm845_vm15, %vm846_vm14  ;;  %v868_v62 = vand.u32 2147483647, %v858_v3  ;;  %vm864_vm5 = vweird.f32 %v858_v3 }
 0x2ab   :  { %v842_v24 = vsub.f32 1.0, %v841_v22  ;;  %v871_v4 = vor.u32 1.1754944e-38, %v870_v45 }
 0x2ac   :  { %vm869_vm7 = vcmp.eq.f32.partialorder %v868_v62, 8.507059e+37 }
 0x2ad   :  { %v2135_v46 = vpop.eup %2134  ;;  %v843_v27 = vmul.f32 %v2133_v16, %v842_v24 }
 0x2ae   :  { %v878_v23 = vadd.f32 1.0, %v2135_v46 }
 0x2af   :  { %v2137_v48 = vpop.eup %2136  ;;  %v844_v52 = vadd.f32 %v2133_v16, %v843_v27 }
 0x2b0   :  { %v860_v50 = vmul.f32 %v2137_v48, %v858_v3  ;;  %2138 = vrcp.f32 %v878_v23  ;;  %vm865_vm2 = vweird.f32 %v2137_v48  ;;  %v890_v26 = vand.u32 2147483648, %v878_v23 }
 0x2b1   :  { %2140 = vtanh.f32 %v811_v53  ;;  %v848_v58 = vsel %vm847_vm1, %v2133_v16, %v844_v52  ;;  %vm866_vm6 = vmor %vm864_vm5, %vm865_vm2  ;;  %vm884_vm9 = vweird.f32 %v878_v23  ;;  %v888_v3 = vand.u32 2147483647, %v878_v23 }
 0x2b2   :  { %v861_v55 = vsub.f32 1.0, %v860_v50  ;;  %v853_v2 = vsel %vm850_vm4, %v852_v51, %v848_v58  ;;  %v891_v47 = vor.u32 1.1754944e-38, %v890_v26 }
 0x2b3   :  { %vm889_vm11 = vcmp.eq.f32.partialorder %v888_v3, 8.507059e+37 }
 0x2b4   :  { %v862_v59 = vmul.f32 %v2137_v48, %v861_v55 }
 0x2b6   :  { %v2139_v0 = vpop.eup %2138  ;;  %v863_v1 = vadd.f32 %v2137_v48, %v862_v59 }
 0x2b7   :  { %v880_v6 = vmul.f32 %v2139_v0, %v878_v23  ;;  %v2141_v10 = vpop.eup %2140  ;;  %vm885_vm8 = vweird.f32 %v2139_v0 }
 0x2b8   :  { %v867_v8 = vsel %vm866_vm6, %v2137_v48, %v863_v1  ;;  %v898_v63 = vmul.f32 %v2141_v10, %v853_v2  ;;  %vm886_vm10 = vmor %vm884_vm9, %vm885_vm8 }
 0x2b9   :  { %v872_v13 = vsel %vm869_vm7, %v871_v4, %v867_v8  ;;  %v881_v15 = vsub.f32 1.0, %v880_v6 }
 0x2ba   :  { %v897_v16 = vmul.f32 %v895_v9, %v872_v13 }
 0x2bb   :  { %v882_v17 = vmul.f32 %v2139_v0, %v881_v15 }
 0x2bc   :  { %v2784_v22 = vadd.f32 %v898_v63, %v897_v16 }
 0x2bd   :  { %v883_v24 = vadd.f32 %v2139_v0, %v882_v17 }
 0x2be   :  { %2142 = vtanh.f32 %v2784_v22 }
 0x2bf   :  { %v887_v46 = vsel %vm886_vm10, %v2139_v0, %v883_v24 }
 0x2c0   :  { %v892_v48 = vsel %vm889_vm11, %v891_v47, %v887_v46 }
 0x2c4   :  { %v2143_v27 = vpop.eup %2142 }
 0x2c5   :  { %v901_v53 = vmul.f32 %v2143_v27, %v892_v48 }
 0x2c7   :  { %v903_v52 = vrot.slane %v901_v53, 4 }
 0x2c9   :  { %2039 = vmatmul.msk.f32.vlgmr.msra.gmra.mxu1 %vm224_vm3, %v903_v52  ;;  %2040 = vmatmul.msk.f32.vlgmr.msra.gmra.mxu3 %vm224_vm3, %v903_v52 }
 0x2ca   :  { %2041 = vmatmul.msk.f32.vlgmr.msra.gmra.mxu0 %vm224_vm3, %v903_v52  ;;  %2042 = vmatmul.msk.f32.vlgmr.msra.gmra.mxu2 %vm224_vm3, %v903_v52 }
 0x2cb   :  { %1168 = vmatpush.msra.mxu1 %v2529_v33  ;;  %1189 = vmatpush.msra.mxu3 %v2534_v34 }
 0x2cc   :  { %1300 = vmatpush.msra.mxu2 %v2517_v31  ;;  %1279 = vmatpush.msra.mxu0 %v2671_v19 }
 0x2cd   :  { %1169 = vmatpush.msra.mxu1 %v2546_v36  ;;  %1190 = vmatpush.msra.mxu3 %v2551_v37 }
 0x2ce   :  { %1301 = vmatpush.msra.mxu2 %v2541_v35  ;;  %1280 = vmatpush.msra.mxu0 %v2676_v20 }
 0x2cf   :  { %1170 = vmatpush.msra.mxu1 %v2568_v40  ;;  %1191 = vmatpush.msra.mxu3 %v2575_v41 }
 0x2d0   :  { %1302 = vmatpush.msra.mxu2 %v2563_v39  ;;  %1281 = vmatpush.msra.mxu0 %v2686_v25 }
 0x2d1   :  { %2043 = vmatmul.msk.f32.vlgmr.msrb.gmra.mxu1 %vm224_vm3, %v903_v52  ;;  %1192 = vmatpush.msra.mxu3 %v2593_v44 }
 0x2d2   :  { %1171 = vmatpush.msra.mxu1 %v2587_v43  ;;  %1303 = vmatpush.msra.mxu2 %v2580_v42 }
 0x2d3   :  { %1282 = vmatpush.msra.mxu0 %v2694_v28 }
 0x2d4   :  { %1324 = vmatpush.msrb.mxu1 %v2506_v29 }
 0x2d6   :  { %1325 = vmatpush.msrb.mxu1 %v2512_v30 }
 0x2d8   :  { %1326 = vmatpush.msrb.mxu1 %v2524_v32 }
 0x2da   :  { %1327 = vmatpush.msrb.mxu1 %v2558_v38 }
 0x346   :  { %v923_v31 = vpop.f32.mrf.mxu1 }
 0x347   :  { %926 = vst.msk [vmem:[#allocation2 + $0x4] sm:$0x3] %vm551_vm0, %v923_v31  ;;  %v968_v23 = vpop.f32.mrf.mxu0 }
 0x348   :  { %v972_v50 = vrot.slane %v968_v23, 2 }
 0x34a   :  { %v974_v49 = vadd.f32 %v972_v50, %v2666_v18 }
 0x34c   :  { %v2045_v54 = vmul.f32 -1.442695, %v974_v49  ;;  %v944_v55 = vpop.f32.mrf.mxu3 }
 0x34d   :  { %v948_v45 = vrot.slane %v944_v55, 2  ;;  %v992_v2 = vpop.f32.mrf.mxu2 }
 0x34e   :  { %2144 = vpow2.f32 %v2045_v54  ;;  %v1016_v29 = vpop.f32.mrf.mxu1  ;;  %v996_v8 = vrot.slane %v992_v2, 2  ;;  %v1082_v54 = vrot.slane %v2784_v22, 6 }
 0x34f   :  { %v950_v58 = vadd.f32 %v948_v45, %v2659_v11  ;;  %v1020_v59 = vrot.slane %v1016_v29, 2 }
 0x351   :  { %v2044_v30 = vmul.f32 -1.442695, %v950_v58  ;;  %v1022_v32 = vadd.f32 %v1020_v59, %v2678_v21  ;;  %v998_v21 = vadd.f32 %v996_v8, %v2704_v56 }
 0x353   :  { %2146 = vpow2.f32 %v2044_v30  ;;  %v2046_v38 = vmul.f32 -1.442695, %v1022_v32 }
 0x354   :  { %v2145_v62 = vpop.eup %2144 }
 0x355   :  { %v1045_v51 = vadd.f32 1.0, %v2145_v62  ;;  %2148 = vpow2.f32 %v2046_v38 }
 0x357   :  { %2150 = vrcp.f32 %v1045_v51  ;;  %v1057_v63 = vand.u32 2147483648, %v1045_v51  ;;  %vm1051_vm13 = vweird.f32 %v1045_v51  ;;  %v1055_v26 = vand.u32 2147483647, %v1045_v51 }
 0x359   :  { %v2147_v0 = vpop.eup %2146  ;;  %v1058_v53 = vor.u32 1.1754944e-38, %v1057_v63  ;;  %vm1056_vm2 = vcmp.eq.f32.partialorder %v1055_v26, 8.507059e+37 }
 0x35a   :  { %v1026_v1 = vadd.f32 1.0, %v2147_v0 }
 0x35b   :  { %v2149_v18 = vpop.eup %2148 }
 0x35c   :  { %2152 = vrcp.f32 %v1026_v1  ;;  %v1065_v6 = vadd.f32 1.0, %v2149_v18  ;;  %v1038_v46 = vand.u32 2147483648, %v1026_v1  ;;  %v1036_v48 = vand.u32 2147483647, %v1026_v1 }
 0x35d   :  { %v2151_v4 = vpop.eup %2150  ;;  %vm1032_vm1 = vweird.f32 %v1026_v1 }
 0x35e   :  { %v1047_v9 = vmul.f32 %v2151_v4, %v1045_v51  ;;  %2154 = vrcp.f32 %v1065_v6  ;;  %vm1052_vm12 = vweird.f32 %v2151_v4  ;;  %v1039_v23 = vor.u32 1.1754944e-38, %v1038_v46 }
 0x35f   :  { %vm2817_vm14 = vmor %vm1051_vm13, %vm1052_vm12  ;;  %2156 = vtanh.f32 %v998_v21  ;;  %vm1037_vm5 = vcmp.eq.f32.partialorder %v1036_v48, 8.507059e+37  ;;  %v1077_v38 = vand.u32 2147483648, %v1065_v6  ;;  %vm1071_vm7 = vweird.f32 %v1065_v6 }
 0x360   :  { %v1048_v11 = vsub.f32 1.0, %v1047_v9  ;;  %v1075_v62 = vand.u32 2147483647, %v1065_v6 }
 0x361   :  { %v1078_v0 = vor.u32 1.1754944e-38, %v1077_v38 }
 0x362   :  { %v2153_v10 = vpop.eup %2152  ;;  %v1049_v13 = vmul.f32 %v2151_v4, %v1048_v11  ;;  %vm1076_vm9 = vcmp.eq.f32.partialorder %v1075_v62, 8.507059e+37 }
 0x363   :  { %v1028_v15 = vmul.f32 %v2153_v10, %v1026_v1  ;;  %vm1033_vm15 = vweird.f32 %v2153_v10 }
 0x364   :  { %v1050_v16 = vadd.f32 %v2151_v4, %v1049_v13  ;;  %v2155_v17 = vpop.eup %2154  ;;  %vm1034_vm4 = vmor %vm1032_vm1, %vm1033_vm15 }
 0x365   :  { %v1029_v24 = vsub.f32 1.0, %v1028_v15  ;;  %v1067_v47 = vmul.f32 %v2155_v17, %v1065_v6  ;;  %v2157_v55 = vpop.eup %2156  ;;  %vm1072_vm6 = vweird.f32 %v2155_v17 }
 0x366   :  { %v1054_v56 = vsel %vm2817_vm14, %v2151_v4, %v1050_v16  ;;  %vm1073_vm8 = vmor %vm1071_vm7, %vm1072_vm6  ;;  %v2837_v4 = vld [vmem:[%s3106_s12 + $0x18] sm:$0xff] }
 0x367   :  { %v1030_v27 = vmul.f32 %v2153_v10, %v1029_v24  ;;  %v1068_v52 = vsub.f32 1.0, %v1067_v47  ;;  %v1059_v50 = vsel %vm1056_vm2, %v1058_v53, %v1054_v56 }
 0x368   :  { %v1084_v58 = vmul.f32 %v1082_v54, %v1059_v50 }
 0x369   :  { %v1031_v31 = vadd.f32 %v2153_v10, %v1030_v27  ;;  %v1069_v29 = vmul.f32 %v2155_v17, %v1068_v52 }
 0x36b   :  { %v1035_v49 = vsel %vm1034_vm4, %v2153_v10, %v1031_v31  ;;  %v1070_v32 = vadd.f32 %v2155_v17, %v1069_v29 }
 0x36c   :  { %v1040_v45 = vsel %vm1037_vm5, %v1039_v23, %v1035_v49 }
 0x36d   :  { %v1085_v59 = vmul.f32 %v2157_v55, %v1040_v45  ;;  %v1074_v51 = vsel %vm1073_vm8, %v2155_v17, %v1070_v32 }
 0x36e   :  { %v1079_v22 = vsel %vm1076_vm9, %v1078_v0, %v1074_v51 }
 0x36f   :  { %v2824_v30 = vadd.f32 %v1085_v59, %v1084_v58 }
 0x371   :  { %2158 = vtanh.f32 %v2824_v30  ;;  %v1257_v45 = vrot.slane %v2824_v30, 6 }
 0x377   :  { %v2159_v1 = vpop.eup %2158 }
 0x378   :  { %v1088_v18 = vmul.f32 %v2159_v1, %v1079_v22 }
 0x37a   :  { %v1090_v2 = vrot.slane %v1088_v18, 6 }
 0x37c   :  { %2047 = vmatmul.msk.f32.vlgmr.msrb.gmra.mxu3 %vm224_vm3, %v1090_v2  ;;  %2048 = vmatmul.msk.f32.vlgmr.msrb.gmra.mxu0 %vm224_vm3, %v1090_v2 }
 0x37d   :  { %2049 = vmatmul.msk.f32.vlgmr.msrb.gmra.mxu2 %vm224_vm3, %v1090_v2  ;;  %2050 = vmatmul.msk.f32.vlgmr.msra.gmra.mxu1 %vm224_vm3, %v1090_v2 }
 0x37e   :  { %1348 = vmatpush.msrb.mxu3 %v2529_v33  ;;  %1372 = vmatpush.msrb.mxu0 %v2534_v34  ;;  %v2855_v33 = vld [vmem:[%s3106_s12 + $0x38] sm:$0xff]  ;;  %v2862_v34 = vld [vmem:[%s3106_s12 + $0x30] sm:$0xff] }
 0x37f   :  { %1466 = vmatpush.msrb.mxu2 %v2671_v19  ;;  %1487 = vmatpush.msra.mxu1 %v2837_v4 }
 0x380   :  { %1349 = vmatpush.msrb.mxu3 %v2546_v36  ;;  %1373 = vmatpush.msrb.mxu0 %v2551_v37  ;;  %v2874_v36 = vld [vmem:[%s3106_s12 + $0x20] sm:$0xff] }
 0x381   :  { %1467 = vmatpush.msrb.mxu2 %v2676_v20  ;;  %1488 = vmatpush.msra.mxu1 %v2541_v35  ;;  %v2868_v35 = vld [vmem:[%s3106_s12 + $0x28] sm:$0xff] }
 0x382   :  { %1350 = vmatpush.msrb.mxu3 %v2568_v40  ;;  %1374 = vmatpush.msrb.mxu0 %v2575_v41 }
 0x383   :  { %1468 = vmatpush.msrb.mxu2 %v2686_v25  ;;  %1489 = vmatpush.msra.mxu1 %v2563_v39 }
 0x384   :  { %2051 = vmatmul.msk.f32.vlgmr.msra.gmra.mxu3 %vm224_vm3, %v1090_v2  ;;  %1375 = vmatpush.msrb.mxu0 %v2593_v44 }
 0x385   :  { %1351 = vmatpush.msrb.mxu3 %v2587_v43  ;;  %1469 = vmatpush.msrb.mxu2 %v2694_v28 }
 0x386   :  { %1490 = vmatpush.msra.mxu1 %v2580_v42 }
 0x387   :  { %1511 = vmatpush.msra.mxu3 %v2855_v33 }
 0x389   :  { %1512 = vmatpush.msra.mxu3 %v2862_v34 }
 0x38b   :  { %1513 = vmatpush.msra.mxu3 %v2868_v35 }
 0x38d   :  { %1514 = vmatpush.msra.mxu3 %v2874_v36 }
 0x3f9   :  { %v1131_v37 = vpop.f32.mrf.mxu0 }
 0x3fa   :  { %v1134_v39 = vadd.f32 %v1131_v37, %v2649_v5  ;;  %v1173_v21 = vpop.f32.mrf.mxu1 }
 0x3fb   :  { %v1176_v24 = vadd.f32 %v1173_v21, %v2651_v7 }
 0x3fc   :  { %v2052_v40 = vmul.f32 -1.442695, %v1134_v39 }
 0x3fe   :  { %2160 = vpow2.f32 %v2052_v40 }
 0x3ff   :  { %v1110_v41 = vpop.f32.mrf.mxu3 }
 0x400   :  { %1113 = vst.msk [vmem:[#allocation2 + $0x6] sm:$0x3] %vm551_vm0, %v1110_v41  ;;  %v1152_v42 = vpop.f32.mrf.mxu2  ;;  %v2893_v41 = vld [vmem:[%s3106_s12 + $0x58] sm:$0xff] }
 0x401   :  { %v1155_v43 = vadd.f32 %v1152_v42, %v2661_v12  ;;  %v2899_v42 = vld [vmem:[%s3106_s12 + $0x78] sm:$0xff] }
 0x403   :  { %v2053_v44 = vmul.f32 -1.442695, %v1155_v43  ;;  %v2906_v43 = vld [vmem:[%s3109_s15 + $0x18] sm:$0xff] }
 0x404   :  { %v2161_v19 = vpop.eup %2160 }
 0x405   :  { %v1201_v20 = vadd.f32 1.0, %v2161_v19  ;;  %2162 = vpow2.f32 %v2053_v44  ;;  %v2912_v44 = vld [vmem:[%s3106_s12 + $0x50] sm:$0xff] }
 0x406   :  { %v2918_v19 = vld [vmem:[%s3106_s12 + $0x70] sm:$0xff] }
 0x407   :  { %2164 = vrcp.f32 %v1201_v20  ;;  %v1194_v25 = vpop.f32.mrf.mxu3  ;;  %v1213_v46 = vand.u32 2147483648, %v1201_v20  ;;  %vm1207_vm11 = vweird.f32 %v1201_v20  ;;  %v1211_v47 = vand.u32 2147483647, %v1201_v20 }
 0x408   :  { %v1197_v28 = vadd.f32 %v1194_v25, %v2663_v14  ;;  %v2933_v25 = vld [vmem:[%s3106_s12 + $0x48] sm:$0xff] }
 0x409   :  { %v1214_v31 = vor.u32 1.1754944e-38, %v1213_v46  ;;  %vm1212_vm14 = vcmp.eq.f32.partialorder %v1211_v47, 8.507059e+37 }
 0x40a   :  { %v2054_v6 = vmul.f32 -1.442695, %v1197_v28  ;;  %v2939_v28 = vld [vmem:[%s3106_s12 + $0x68] sm:$0xff] }
 0x40b   :  { %v2163_v9 = vpop.eup %2162 }
 0x40c   :  { %v1220_v8 = vadd.f32 1.0, %v2163_v9  ;;  %2166 = vpow2.f32 %v2054_v6  ;;  %v2238_v6 = vld [vmem:[%s3106_s12 + $0x8] sm:$0xff] }
 0x40d   :  { %v2165_v11 = vpop.eup %2164  ;;  %v2948_v9 = vld [vmem:[%s3109_s15 + $0x8] sm:$0xff] }
 0x40e   :  { %v1203_v10 = vmul.f32 %v2165_v11, %v1201_v20  ;;  %2168 = vrcp.f32 %v1220_v8  ;;  %vm1208_vm10 = vweird.f32 %v2165_v11  ;;  %v1232_v48 = vand.u32 2147483648, %v1220_v8  ;;  %v2927_v20 = vld [vmem:[%s3109_s15 + $0x10] sm:$0xff] }
 0x40f   :  { %vm1209_vm12 = vmor %vm1207_vm11, %vm1208_vm10  ;;  %v1230_v52 = vand.u32 2147483647, %v1220_v8  ;;  %vm1226_vm15 = vweird.f32 %v1220_v8 }
 0x410   :  { %v1204_v13 = vsub.f32 1.0, %v1203_v10  ;;  %v1233_v54 = vor.u32 1.1754944e-38, %v1232_v48  ;;  %v2242_v10 = vld [vmem:[%s3106_s12] sm:$0xff] }
 0x411   :  { %vm1231_vm2 = vcmp.eq.f32.partialorder %v1230_v52, 8.507059e+37 }
 0x412   :  { %v2167_v15 = vpop.eup %2166  ;;  %v1205_v63 = vmul.f32 %v2165_v11, %v1204_v13  ;;  %v2971_v13 = vld [vmem:[%s3109_s15] sm:$0xff] }
 0x413   :  { %v1240_v16 = vadd.f32 1.0, %v2167_v15 }
 0x414   :  { %v2169_v17 = vpop.eup %2168  ;;  %v1206_v26 = vadd.f32 %v2165_v11, %v1205_v63 }
 0x415   :  { %v1222_v3 = vmul.f32 %v2169_v17, %v1220_v8  ;;  %2170 = vrcp.f32 %v1240_v16  ;;  %vm1227_vm13 = vweird.f32 %v2169_v17  ;;  %v1252_v22 = vand.u32 2147483648, %v1240_v16  ;;  %v2955_v8 = vld [vmem:[%s3106_s12 + $0x60] sm:$0xff] }
 0x416   :  { %2172 = vtanh.f32 %v1176_v24  ;;  %v1210_v56 = vsel %vm1209_vm12, %v2165_v11, %v1206_v26  ;;  %vm1228_vm1 = vmor %vm1226_vm15, %vm1227_vm13  ;;  %vm1246_vm5 = vweird.f32 %v1240_v16  ;;  %v1250_v18 = vand.u32 2147483647, %v1240_v16  ;;  %v2961_v11 = vld [vmem:[%s3106_s12 + $0x40] sm:$0xff] }
 0x417   :  { %v1223_v27 = vsub.f32 1.0, %v1222_v3  ;;  %v1215_v49 = vsel %vm1212_vm14, %v1214_v31, %v1210_v56  ;;  %v1253_v30 = vor.u32 1.1754944e-38, %v1252_v22 }
 0x418   :  { %vm1251_vm7 = vcmp.eq.f32.partialorder %v1250_v18, 8.507059e+37 }
 0x419   :  { %v1224_v53 = vmul.f32 %v2169_v17, %v1223_v27 }
 0x41b   :  { %v2171_v23 = vpop.eup %2170  ;;  %v1225_v50 = vadd.f32 %v2169_v17, %v1224_v53 }
 0x41c   :  { %v1242_v55 = vmul.f32 %v2171_v23, %v1240_v16  ;;  %v2173_v58 = vpop.eup %2172  ;;  %vm1247_vm4 = vweird.f32 %v2171_v23 }
 0x41d   :  { %v1229_v29 = vsel %vm1228_vm1, %v2169_v17, %v1225_v50  ;;  %v1260_v38 = vmul.f32 %v2173_v58, %v1215_v49  ;;  %vm1248_vm6 = vmor %vm1246_vm5, %vm1247_vm4 }
 0x41e   :  { %v1234_v59 = vsel %vm1231_vm2, %v1233_v54, %v1229_v29  ;;  %v1243_v32 = vsub.f32 1.0, %v1242_v55 }
 0x41f   :  { %v1259_v62 = vmul.f32 %v1257_v45, %v1234_v59 }
 0x420   :  { %v1244_v51 = vmul.f32 %v2171_v23, %v1243_v32 }
 0x421   :  { %v2883_v0 = vadd.f32 %v1260_v38, %v1259_v62 }
 0x422   :  { %v1245_v1 = vadd.f32 %v2171_v23, %v1244_v51 }
 0x423   :  { %2174 = vtanh.f32 %v2883_v0 }
 0x424   :  { %v1249_v2 = vsel %vm1248_vm6, %v2171_v23, %v1245_v1 }
 0x425   :  { %v1254_v39 = vsel %vm1251_vm7, %v1253_v30, %v1249_v2 }
 0x429   :  { %v2175_v37 = vpop.eup %2174 }
 0x42a   :  { %v1263_v40 = vmul.f32 %v2175_v37, %v1254_v39 }
 0x42c   :  { %2055 = vmatmul.msk.f32.vlgmr.msra.gmra.mxu0 %vm224_vm3, %v1263_v40  ;;  %2056 = vmatmul.msk.f32.vlgmr.msra.gmra.mxu2 %vm224_vm3, %v1263_v40 }
 0x42d   :  { %2057 = vmatmul.msk.f32.vlgmr.msrb.gmra.mxu1 %vm224_vm3, %v1263_v40  ;;  %2058 = vmatmul.msk.f32.vlgmr.msrb.gmra.mxu3 %vm224_vm3, %v1263_v40 }
 0x42e   :  { %1535 = vmatpush.msra.mxu0 %v2893_v41  ;;  %1559 = vmatpush.msra.mxu2 %v2899_v42 }
 0x42f   :  { %1674 = vmatpush.msrb.mxu3 %v2837_v4  ;;  %1653 = vmatpush.msrb.mxu1 %v2906_v43  ;;  %v2234_v4 = vld [vmem:[%s3106_s12 + $0x10] sm:$0xff]  ;;  %s1953_s12 = sshll.u32 %s2297_s22, 4  ;;  %s1954_s12 = int_to_ptr.vmem [resolvable:$true] %s1953_s12 }
 0x430   :  { %1536 = vmatpush.msra.mxu0 %v2912_v44  ;;  %1560 = vmatpush.msra.mxu2 %v2918_v19 }
 0x431   :  { %1675 = vmatpush.msrb.mxu3 %v2234_v4  ;;  %1654 = vmatpush.msrb.mxu1 %v2927_v20 }
 0x432   :  { %1537 = vmatpush.msra.mxu0 %v2933_v25  ;;  %1561 = vmatpush.msra.mxu2 %v2939_v28 }
 0x433   :  { %1676 = vmatpush.msrb.mxu3 %v2238_v6  ;;  %1655 = vmatpush.msrb.mxu1 %v2948_v9 }
 0x434   :  { %2059 = vmatmul.msk.f32.vlgmr.msrb.gmra.mxu0 %vm224_vm3, %v1263_v40  ;;  %1562 = vmatpush.msra.mxu2 %v2955_v8 }
 0x435   :  { %1538 = vmatpush.msra.mxu0 %v2961_v11  ;;  %1677 = vmatpush.msrb.mxu3 %v2242_v10 }
 0x436   :  { %1656 = vmatpush.msrb.mxu1 %v2971_v13 }
 0x437   :  { %1698 = vmatpush.msrb.mxu0 %v2855_v33 }
 0x439   :  { %1699 = vmatpush.msrb.mxu0 %v2862_v34 }
 0x43b   :  { %1700 = vmatpush.msrb.mxu0 %v2868_v35 }
 0x43d   :  { %1701 = vmatpush.msrb.mxu0 %v2874_v36 }
 0x4a9   :  { %v1284_v21 = vpop.f32.mrf.mxu0 }
 0x4aa   :  { %1287 = vst.msk [vmem:[#allocation2 + $0x8] sm:$0x3] %vm551_vm0, %v1284_v21  ;;  %v1329_v15 = vpop.f32.mrf.mxu1 }
 0x4ab   :  { %v1333_v63 = vrot.slane %v1329_v15, 6  ;;  %v1443_v15 = vrot.slane %v2883_v0, 6 }
 0x4ad   :  { %v1335_v33 = vadd.f32 %v1333_v63, %v2661_v12 }
 0x4af   :  { %v2061_v16 = vmul.f32 -1.442695, %v1335_v33  ;;  %v1305_v17 = vpop.f32.mrf.mxu2 }
 0x4b0   :  { %v1309_v24 = vrot.slane %v1305_v17, 6  ;;  %v1353_v52 = vpop.f32.mrf.mxu3 }
 0x4b1   :  { %2176 = vpow2.f32 %v2061_v16  ;;  %v1377_v26 = vpop.f32.mrf.mxu0  ;;  %v1357_v49 = vrot.slane %v1353_v52, 6 }
 0x4b2   :  { %v1311_v3 = vadd.f32 %v1309_v24, %v2649_v5  ;;  %v1381_v46 = vrot.slane %v1377_v26, 6 }
 0x4b3   :  { %v1359_v29 = vadd.f32 %v1357_v49, %v2651_v7 }
 0x4b4   :  { %v2060_v34 = vmul.f32 -1.442695, %v1311_v3  ;;  %v1383_v35 = vadd.f32 %v1381_v46, %v2663_v14 }
 0x4b6   :  { %2178 = vpow2.f32 %v2060_v34  ;;  %v2062_v36 = vmul.f32 -1.442695, %v1383_v35 }
 0x4b7   :  { %v2177_v47 = vpop.eup %2176 }
 0x4b8   :  { %v1406_v27 = vadd.f32 1.0, %v2177_v47  ;;  %2180 = vpow2.f32 %v2062_v36 }
 0x4ba   :  { %2182 = vrcp.f32 %v1406_v27  ;;  %v1418_v59 = vand.u32 2147483648, %v1406_v27  ;;  %vm1412_vm9 = vweird.f32 %v1406_v27  ;;  %v1416_v51 = vand.u32 2147483647, %v1406_v27 }
 0x4bc   :  { %v2179_v48 = vpop.eup %2178  ;;  %v1419_v39 = vor.u32 1.1754944e-38, %v1418_v59  ;;  %vm1417_vm13 = vcmp.eq.f32.partialorder %v1416_v51, 8.507059e+37  ;;  %v1853_v59 = vld [vmem:[%s3108_s14 + $0x8] sm:$0xff]  ;;  %v1852_v51 = vld [vmem:[%s3108_s14] sm:$0xff] }
 0x4bd   :  { %v1387_v56 = vadd.f32 1.0, %v2179_v48 }
 0x4be   :  { %v2181_v53 = vpop.eup %2180 }
 0x4bf   :  { %2184 = vrcp.f32 %v1387_v56  ;;  %v1426_v23 = vadd.f32 1.0, %v2181_v53  ;;  %v1399_v22 = vand.u32 2147483648, %v1387_v56  ;;  %v1397_v30 = vand.u32 2147483647, %v1387_v56 }
 0x4c0   :  { %v2183_v31 = vpop.eup %2182  ;;  %vm1393_vm12 = vweird.f32 %v1387_v56 }
 0x4c1   :  { %v1408_v50 = vmul.f32 %v2183_v31, %v1406_v27  ;;  %2186 = vrcp.f32 %v1426_v23  ;;  %vm1413_vm8 = vweird.f32 %v2183_v31  ;;  %v1400_v6 = vor.u32 1.1754944e-38, %v1399_v22 }
 0x4c2   :  { %vm2982_vm10 = vmor %vm1412_vm9, %vm1413_vm8  ;;  %2188 = vtanh.f32 %v1359_v29  ;;  %vm1398_vm15 = vcmp.eq.f32.partialorder %v1397_v30, 8.507059e+37  ;;  %v1438_v46 = vand.u32 2147483648, %v1426_v23  ;;  %vm1432_vm2 = vweird.f32 %v1426_v23 }
 0x4c3   :  { %v1409_v54 = vsub.f32 1.0, %v1408_v50  ;;  %v1436_v34 = vand.u32 2147483647, %v1426_v23 }
 0x4c4   :  { %v1439_v36 = vor.u32 1.1754944e-38, %v1438_v46 }
 0x4c5   :  { %v2185_v55 = vpop.eup %2184  ;;  %v1410_v45 = vmul.f32 %v2183_v31, %v1409_v54  ;;  %vm1437_vm5 = vcmp.eq.f32.partialorder %v1436_v34, 8.507059e+37 }
 0x4c6   :  { %v1389_v58 = vmul.f32 %v2185_v55, %v1387_v56  ;;  %vm1394_vm11 = vweird.f32 %v2185_v55 }
 0x4c7   :  { %v1411_v32 = vadd.f32 %v2183_v31, %v1410_v45  ;;  %v2187_v38 = vpop.eup %2186  ;;  %vm1395_vm14 = vmor %vm1393_vm12, %vm1394_vm11  ;;  %v1854_v45 = vld [vmem:[%s3108_s14 + $0x10] sm:$0xff] }
 0x4c8   :  { %v1390_v62 = vsub.f32 1.0, %v1389_v58  ;;  %v1428_v18 = vmul.f32 %v2187_v38, %v1426_v23  ;;  %v2189_v63 = vpop.eup %2188  ;;  %vm1433_vm1 = vweird.f32 %v2187_v38 }
 0x4c9   :  { %v1415_v37 = vsel %vm2982_vm10, %v2183_v31, %v1411_v32  ;;  %vm1434_vm4 = vmor %vm1432_vm2, %vm1433_vm1 }
 0x4ca   :  { %v1391_v2 = vmul.f32 %v2185_v55, %v1390_v62  ;;  %v1429_v40 = vsub.f32 1.0, %v1428_v18  ;;  %v1420_v10 = vsel %vm1417_vm13, %v1419_v39, %v1415_v37 }
 0x4cb   :  { %v1445_v17 = vmul.f32 %v1443_v15, %v1420_v10 }
 0x4cc   :  { %v1392_v4 = vadd.f32 %v2185_v55, %v1391_v2  ;;  %v1430_v16 = vmul.f32 %v2187_v38, %v1429_v40 }
 0x4ce   :  { %v1396_v21 = vsel %vm1395_vm14, %v2185_v55, %v1392_v4  ;;  %v1431_v3 = vadd.f32 %v2187_v38, %v1430_v16  ;;  %v1855_v55 = vld [vmem:[%s3108_s14 + $0x18] sm:$0xff] }
 0x4cf   :  { %v1401_v33 = vsel %vm1398_vm15, %v1400_v6, %v1396_v21 }
 0x4d0   :  { %v1446_v24 = vmul.f32 %v2189_v63, %v1401_v33  ;;  %v1435_v35 = vsel %vm1434_vm4, %v2187_v38, %v1431_v3 }
 0x4d1   :  { %v1440_v0 = vsel %vm1437_vm5, %v1439_v36, %v1435_v35 }
 0x4d2   :  { %v2989_v26 = vadd.f32 %v1446_v24, %v1445_v17 }
 0x4d4   :  { %2190 = vtanh.f32 %v2989_v26  ;;  %v1630_v24 = vrot.slane %v2989_v26, 6 }
 0x4da   :  { %v2191_v47 = vpop.eup %2190 }
 0x4db   :  { %v1449_v27 = vmul.f32 %v2191_v47, %v1440_v0 }
 0x4dd   :  { %v1451_v48 = vrot.slane %v1449_v27, 2 }
 0x4df   :  { %2063 = vmatmul.msk.f32.vlgmr.msrb.gmra.mxu2 %vm224_vm3, %v1451_v48  ;;  %2064 = vmatmul.msk.f32.vlgmr.msra.gmra.mxu1 %vm224_vm3, %v1451_v48 }
 0x4e0   :  { %2065 = vmatmul.msk.f32.vlgmr.msra.gmra.mxu3 %vm224_vm3, %v1451_v48  ;;  %2066 = vmatmul.msk.f32.vlgmr.msra.gmra.mxu0 %vm224_vm3, %v1451_v48 }
 0x4e1   :  { %1722 = vmatpush.msrb.mxu2 %v2893_v41  ;;  %1746 = vmatpush.msra.mxu1 %v2899_v42 }
 0x4e2   :  { %1840 = vmatpush.msra.mxu3 %v2906_v43  ;;  %1876 = vmatpush.msra.mxu0 %v1855_v55 }
 0x4e3   :  { %1723 = vmatpush.msrb.mxu2 %v2912_v44  ;;  %1747 = vmatpush.msra.mxu1 %v2918_v19 }
 0x4e4   :  { %1841 = vmatpush.msra.mxu3 %v2927_v20  ;;  %1877 = vmatpush.msra.mxu0 %v1854_v45 }
 0x4e5   :  { %1724 = vmatpush.msrb.mxu2 %v2933_v25  ;;  %1748 = vmatpush.msra.mxu1 %v2939_v28 }
 0x4e6   :  { %1842 = vmatpush.msra.mxu3 %v2948_v9  ;;  %1878 = vmatpush.msra.mxu0 %v1853_v59 }
 0x4e7   :  { %2067 = vmatmul.msk.f32.vlgmr.msra.gmra.mxu2 %vm224_vm3, %v1451_v48  ;;  %1749 = vmatpush.msra.mxu1 %v2955_v8 }
 0x4e8   :  { %1725 = vmatpush.msrb.mxu2 %v2961_v11  ;;  %1843 = vmatpush.msra.mxu3 %v2971_v13 }
 0x4e9   :  { %1879 = vmatpush.msra.mxu0 %v1852_v51 }
 0x55c   :  { %v1492_v41 = vpop.f32.mrf.mxu1 }
 0x55d   :  { %v1496_v42 = vrot.slane %v1492_v41, 4  ;;  %v1540_v49 = vpop.f32.mrf.mxu0 }
 0x55e   :  { %v1544_v58 = vrot.slane %v1540_v49, 4 }
 0x55f   :  { %v1498_v43 = vadd.f32 %v1496_v42, %v2649_v5 }
 0x560   :  { %v1546_v22 = vadd.f32 %v1544_v58, %v2651_v7 }
 0x561   :  { %v2068_v44 = vmul.f32 -1.442695, %v1498_v43 }
 0x562   :  { %v1471_v19 = vpop.f32.mrf.mxu2 }
 0x563   :  { %2192 = vpow2.f32 %v2068_v44  ;;  %1474 = vst.msk [vmem:[#allocation2 + $0xa] sm:$0x3] %vm551_vm0, %v1471_v19  ;;  %v1516_v20 = vpop.f32.mrf.mxu3 }
 0x564   :  { %v1520_v25 = vrot.slane %v1516_v20, 4 }
 0x566   :  { %v1522_v28 = vadd.f32 %v1520_v25, %v2661_v12 }
 0x568   :  { %v2069_v9 = vmul.f32 -1.442695, %v1522_v28  ;;  %v2089_v28 = vld [vmem:[%s3101_s7] ss:$0 sm:$0xff] }
 0x569   :  { %v2193_v56 = vpop.eup %2192 }
 0x56a   :  { %v1574_v8 = vadd.f32 1.0, %v2193_v56  ;;  %2194 = vpow2.f32 %v2069_v9  ;;  %v1564_v11 = vpop.f32.mrf.mxu2  ;;  %v144_v9 = vadd.f32 %v2089_v28, %v2639_v60  ;;  %v1897_v60 = vld [vmem:[%s3111_s17 + $0x10] sm:$0xff] }
 0x56b   :  { %v1568_v53 = vrot.slane %v1564_v11, 4 }
 0x56c   :  { %2196 = vrcp.f32 %v1574_v8  ;;  %v1586_v30 = vand.u32 2147483648, %v1574_v8  ;;  %vm1580_vm7 = vweird.f32 %v1574_v8  ;;  %v1584_v37 = vand.u32 2147483647, %v1574_v8 }
 0x56d   :  { %v1570_v13 = vadd.f32 %v1568_v53, %v2663_v14  ;;  %v146_v56 = vmax.f32 %v144_v9, 0.0 }
 0x56e   :  { %v1587_v21 = vor.u32 1.1754944e-38, %v1586_v30  ;;  %vm1585_vm10 = vcmp.eq.f32.partialorder %v1584_v37, 8.507059e+37 }
 0x56f   :  { %v2070_v52 = vmul.f32 -1.442695, %v1570_v13  ;;  %v1898_v13 = vld [vmem:[%s3111_s17 + $0x18] sm:$0xff] }
 0x570   :  { %v2195_v31 = vpop.eup %2194  ;;  %1921 = vmatpush.msra.mxu2 %v1898_v13 }
 0x571   :  { %v1593_v23 = vadd.f32 1.0, %v2195_v31  ;;  %2198 = vpow2.f32 %v2070_v52 }
 0x572   :  { %v2197_v50 = vpop.eup %2196  ;;  %1922 = vmatpush.msra.mxu2 %v1897_v60 }
 0x573   :  { %v1576_v54 = vmul.f32 %v2197_v50, %v1574_v8  ;;  %2200 = vrcp.f32 %v1593_v23  ;;  %vm1581_vm6 = vweird.f32 %v2197_v50  ;;  %v1605_v40 = vand.u32 2147483648, %v1593_v23 }
 0x574   :  { %vm1582_vm8 = vmor %vm1580_vm7, %vm1581_vm6  ;;  %v1603_v10 = vand.u32 2147483647, %v1593_v23  ;;  %vm1599_vm11 = vweird.f32 %v1593_v23  ;;  %v138_v8 = vadd.f32 %v2641_v61, %v2637_v57  ;;  %v1896_v57 = vld [vmem:[%s3111_s17 + $0x8] sm:$0xff]  ;;  %v1895_v61 = vld [vmem:[%s3111_s17] sm:$0xff] }
 0x575   :  { %v1577_v29 = vsub.f32 1.0, %v1576_v54  ;;  %v1606_v16 = vor.u32 1.1754944e-38, %v1605_v40  ;;  %1923 = vmatpush.msra.mxu2 %v1896_v57 }
 0x576   :  { %vm1604_vm13 = vcmp.eq.f32.partialorder %v1603_v10, 8.507059e+37  ;;  %v145_v11 = vadd.f32 %v2089_v28, %v138_v8 }
 0x577   :  { %v2199_v32 = vpop.eup %2198  ;;  %v1578_v38 = vmul.f32 %v2197_v50, %v1577_v29  ;;  %1924 = vmatpush.msra.mxu2 %v1895_v61  ;;  %v3060_v29 = vld [vmem:[%s3110_s16] ss:$0 sm:$0xff] }
 0x578   :  { %v1613_v62 = vadd.f32 1.0, %v2199_v32  ;;  %v147_v53 = vmax.f32 %v145_v11, 0.0  ;;  %v1856_v32 = vld [vmem:[#allocation2] sm:$0xff] }
 0x579   :  { %v2201_v1 = vpop.eup %2200  ;;  %v1579_v18 = vadd.f32 %v2197_v50, %v1578_v38 }
 0x57a   :  { %v1595_v2 = vmul.f32 %v2201_v1, %v1593_v23  ;;  %2202 = vrcp.f32 %v1613_v62  ;;  %vm1600_vm9 = vweird.f32 %v2201_v1  ;;  %v1625_v41 = vand.u32 2147483648, %v1613_v62 }
 0x57b   :  { %2204 = vtanh.f32 %v1546_v22  ;;  %v1583_v4 = vsel %vm1582_vm8, %v2197_v50, %v1579_v18  ;;  %vm1601_vm12 = vmor %vm1599_vm11, %vm1600_vm9  ;;  %vm1619_vm15 = vweird.f32 %v1613_v62  ;;  %v1623_v42 = vand.u32 2147483647, %v1613_v62 }
 0x57c   :  { %v1596_v39 = vsub.f32 1.0, %v1595_v2  ;;  %v1588_v33 = vsel %vm1585_vm10, %v1587_v21, %v1583_v4  ;;  %v1626_v26 = vor.u32 1.1754944e-38, %v1625_v41 }
 0x57d   :  { %vm1624_vm2 = vcmp.eq.f32.partialorder %v1623_v42, 8.507059e+37 }
 0x57e   :  { %v1597_v6 = vmul.f32 %v2201_v1, %v1596_v39 }
 0x580   :  { %v2203_v15 = vpop.eup %2202  ;;  %v1598_v63 = vadd.f32 %v2201_v1, %v1597_v6 }
 0x581   :  { %v1615_v17 = vmul.f32 %v2203_v15, %v1613_v62  ;;  %v2205_v46 = vpop.eup %2204  ;;  %vm1620_vm14 = vweird.f32 %v2203_v15 }
 0x582   :  { %v1602_v3 = vsel %vm1601_vm12, %v2201_v1, %v1598_v63  ;;  %v1633_v36 = vmul.f32 %v2205_v46, %v1588_v33  ;;  %vm1621_vm1 = vmor %vm1619_vm15, %vm1620_vm14  ;;  %vm1849_vm12 = vcmask 261126  }
 0x583   :  { %v1607_v34 = vsel %vm1604_vm13, %v1606_v16, %v1602_v3  ;;  %v1616_v35 = vsub.f32 1.0, %v1615_v17 }
 0x584   :  { %v1632_v47 = vmul.f32 %v1630_v24, %v1607_v34 }
 0x585   :  { %v1617_v0 = vmul.f32 %v2203_v15, %v1616_v35 }
 0x586   :  { %v3027_v27 = vadd.f32 %v1633_v36, %v1632_v47 }
 0x587   :  { %v1618_v48 = vadd.f32 %v2203_v15, %v1617_v0 }
 0x588   :  { %2206 = vtanh.f32 %v3027_v27 }
 0x589   :  { %v1622_v43 = vsel %vm1621_vm1, %v2203_v15, %v1618_v48 }
 0x58a   :  { %v1627_v19 = vsel %vm1624_vm2, %v1626_v26, %v1622_v43  ;;  %vm1932_vm2 = vcmask 7168  }
 0x58e   :  { %v2207_v44 = vpop.eup %2206 }
 0x58f   :  { %v1636_v20 = vmul.f32 %v2207_v44, %v1627_v19 }
 0x591   :  { %v1638_v25 = vrot.slane %v1636_v20, 4  ;;  %v1817_v20 = vrot.slane %v3027_v27, 6 }
 0x593   :  { %2071 = vmatmul.msk.f32.vlgmr.msrb.gmra.mxu1 %vm224_vm3, %v1638_v25  ;;  %2072 = vmatmul.msk.f32.vlgmr.msrb.gmra.mxu3 %vm224_vm3, %v1638_v25 }
 0x594   :  { %2073 = vmatmul.msk.f32.vlgmr.msrb.gmra.mxu0 %vm224_vm3, %v1638_v25  ;;  %2074 = vmatmul.msk.f32.vlgmr.msrb.gmra.mxu2 %vm224_vm3, %v1638_v25 }
 0x59b   :  { %2075 = vmatmul.msk.f32.vlgmr.msra.gmra.mxu1 %vm224_vm3, %v1638_v25 }
 0x59c   :  { %2080 = vmatmul.msk.f32.vlgmr.msra.gmra.mxu0 %vm224_vm3, %v146_v56 }
 0x5a4   :  { %2081 = vmatmul.msk.f32.gmra.mxu0 %vm224_vm3, %v147_v53 }
 0x610   :  { %v1658_v52 = vpop.f32.mrf.mxu1 }
 0x611   :  { %1661 = vst.msk [vmem:[#allocation2 + $0xc] sm:$0x3] %vm551_vm0, %v1658_v52  ;;  %v1703_v31 = vpop.f32.mrf.mxu0 }
 0x612   :  { %v1707_v23 = vrot.slane %v1703_v31, 2 }
 0x614   :  { %v1709_v50 = vadd.f32 %v1707_v23, %v2661_v12 }
 0x616   :  { %v2077_v49 = vmul.f32 -1.442695, %v1709_v50  ;;  %v1679_v54 = vpop.f32.mrf.mxu3  ;;  %v2095_v50 = vld [vmem:[#allocation3] ss:$0 sm:$0xff] }
 0x617   :  { %v1683_v55 = vrot.slane %v1679_v54, 2  ;;  %v1727_v40 = vpop.f32.mrf.mxu2 }
 0x618   :  { %2208 = vpow2.f32 %v2077_v49  ;;  %v1751_v45 = vpop.f32.mrf.mxu1 }
 0x619   :  { %v1685_v58 = vadd.f32 %v1683_v55, %v2649_v5  ;;  %v1755_v59 = vrot.slane %v1751_v45, 2  ;;  %v1881_v38 = vpop.f32.mrf.mxu0 }
 0x61a   :  { %v1882_v62 = vadd.f32 %v1881_v38, %v1856_v32 }
 0x61b   :  { %v2076_v51 = vmul.f32 -1.442695, %v1685_v58  ;;  %v1757_v1 = vadd.f32 %v1755_v59, %v2663_v14  ;;  %v1731_v14 = vrot.slane %v1727_v40, 2 }
 0x61c   :  { %v1891_v12 = vadd.f32 %v3060_v29, %v1882_v62 }
 0x61d   :  { %2210 = vpow2.f32 %v2076_v51  ;;  %v2078_v22 = vmul.f32 -1.442695, %v1757_v1  ;;  %v1733_v33 = vadd.f32 %v1731_v14, %v2651_v7 }
 0x61e   :  { %v2209_v18 = vpop.eup %2208  ;;  %v1893_v2 = vmax.f32 %v1891_v12, 0.0 }
 0x61f   :  { %v1780_v30 = vadd.f32 1.0, %v2209_v18  ;;  %2212 = vpow2.f32 %v2078_v22 }
 0x620   :  { %2082 = vmatmul.msk.f32.vlgmr.msra.gmra.mxu2 %vm224_vm3, %v1893_v2 }
 0x621   :  { %2214 = vrcp.f32 %v1780_v30  ;;  %v1792_v17 = vand.u32 2147483648, %v1780_v30  ;;  %vm1786_vm5 = vweird.f32 %v1780_v30  ;;  %v1790_v34 = vand.u32 2147483647, %v1780_v30  ;;  %v1884_v45 = vpop.f32.mrf.mxu0 }
 0x623   :  { %v2211_v37 = vpop.eup %2210  ;;  %v1793_v41 = vor.u32 1.1754944e-38, %v1792_v17  ;;  %vm1791_vm9 = vcmp.eq.f32.partialorder %v1790_v34, 8.507059e+37 }
 0x624   :  { %v1761_v5 = vadd.f32 1.0, %v2211_v37 }
 0x625   :  { %v2213_v39 = vpop.eup %2212 }
 0x626   :  { %2216 = vrcp.f32 %v1761_v5  ;;  %v1800_v6 = vadd.f32 1.0, %v2213_v39  ;;  %v1773_v36 = vand.u32 2147483648, %v1761_v5  ;;  %v1771_v48 = vand.u32 2147483647, %v1761_v5 }
 0x627   :  { %v2215_v4 = vpop.eup %2214  ;;  %vm1767_vm8 = vweird.f32 %v1761_v5 }
 0x628   :  { %v1782_v10 = vmul.f32 %v2215_v4, %v1780_v30  ;;  %2218 = vrcp.f32 %v1800_v6  ;;  %vm1787_vm4 = vweird.f32 %v2215_v4  ;;  %v1774_v26 = vor.u32 1.1754944e-38, %v1773_v36 }
 0x629   :  { %vm3067_vm6 = vmor %vm1786_vm5, %vm1787_vm4  ;;  %2220 = vtanh.f32 %v1733_v33  ;;  %vm1772_vm11 = vcmp.eq.f32.partialorder %v1771_v48, 8.507059e+37  ;;  %v1812_v13 = vand.u32 2147483648, %v1800_v6  ;;  %vm1806_vm14 = vweird.f32 %v1800_v6 }
 0x62a   :  { %v1783_v21 = vsub.f32 1.0, %v1782_v10  ;;  %v1810_v60 = vand.u32 2147483647, %v1800_v6 }
 0x62b   :  { %v1813_v61 = vor.u32 1.1754944e-38, %v1812_v13 }
 0x62c   :  { %v2217_v15 = vpop.eup %2216  ;;  %v1784_v63 = vmul.f32 %v2215_v4, %v1783_v21  ;;  %vm1811_vm1 = vcmp.eq.f32.partialorder %v1810_v60, 8.507059e+37 }
 0x62d   :  { %v1763_v16 = vmul.f32 %v2217_v15, %v1761_v5  ;;  %vm1768_vm7 = vweird.f32 %v2217_v15 }
 0x62e   :  { %v1785_v24 = vadd.f32 %v2215_v4, %v1784_v63  ;;  %v2219_v3 = vpop.eup %2218  ;;  %vm1769_vm10 = vmor %vm1767_vm8, %vm1768_vm7 }
 0x62f   :  { %v1764_v46 = vsub.f32 1.0, %v1763_v16  ;;  %v1802_v47 = vmul.f32 %v2219_v3, %v1800_v6  ;;  %v2221_v25 = vpop.eup %2220  ;;  %vm1807_vm13 = vweird.f32 %v2219_v3 }
 0x630   :  { %v1789_v7 = vsel %vm3067_vm6, %v2215_v4, %v1785_v24  ;;  %vm1808_vm15 = vmor %vm1806_vm14, %vm1807_vm13 }
 0x631   :  { %v1765_v0 = vmul.f32 %v2217_v15, %v1764_v46  ;;  %v1803_v42 = vsub.f32 1.0, %v1802_v47  ;;  %v1794_v44 = vsel %vm1791_vm9, %v1793_v41, %v1789_v7 }
 0x632   :  { %v1819_v56 = vmul.f32 %v1817_v20, %v1794_v44 }
 0x633   :  { %v1766_v43 = vadd.f32 %v2217_v15, %v1765_v0  ;;  %v1804_v9 = vmul.f32 %v2219_v3, %v1803_v42 }
 0x635   :  { %v1770_v19 = vsel %vm1769_vm10, %v2217_v15, %v1766_v43  ;;  %v1805_v53 = vadd.f32 %v2219_v3, %v1804_v9 }
 0x636   :  { %v1775_v28 = vsel %vm1772_vm11, %v1774_v26, %v1770_v19 }
 0x637   :  { %v1820_v8 = vmul.f32 %v2221_v25, %v1775_v28  ;;  %v1809_v57 = vsel %vm1808_vm15, %v2219_v3, %v1805_v53 }
 0x638   :  { %v1814_v52 = vsel %vm1811_vm1, %v1813_v61, %v1809_v57 }
 0x639   :  { %v1821_v11 = vadd.f32 %v1820_v8, %v1819_v56 }
 0x63b   :  { %2222 = vtanh.f32 %v1821_v11  ;;  %1851 = vst.msk [vmem:[#allocation6 - $0x6] sm:$0xc0] %vm1849_vm12, %v1821_v11 }
 0x63c   :  { %1958 = dma.vmem_to_hbm [thread:$0]  %s1954_s12, 32, %s1956_s1, [#allocation7]  }
 0x641   :  { %v2223_v27 = vpop.eup %2222 }
 0x642   :  { %v1823_v31 = vmul.f32 %v2223_v27, %v1814_v52 }
 0x644   :  { %v1825_v23 = vrot.slane %v1823_v31, 6  ;;  %1850 = vst.msk [vmem:[#allocation4 - $0x6] sm:$0xc0] %vm1849_vm12, %v1823_v31 }
 0x645   :  { %1947 = dma.vmem_to_hbm [thread:$0]  %s1943_s13, 32, %s1945_s5, [#allocation5]  }
 0x646   :  { %2079 = vmatmul.msk.f32.vlgmr.msra.gmra.mxu3 %vm224_vm3, %v1825_v23 }
 0x6a3   :  { %v1926_v49 = vpop.f32.mrf.mxu2 }
 0x6a4   :  { %v1927_v54 = vadd.f32 %v2095_v50, %v1926_v49 }
 0x6a6   :  { %1933 = vst.msk [vmem:[%s3113_s19] sm:$0xff] %vm1932_vm2, %v1927_v54 }
 0x6c9   :  { %v1845_v55 = vpop.f32.mrf.mxu3 }
 0x6ca   :  { %1848 = vst.msk [vmem:[#allocation2 + $0xe] sm:$0x3] %vm551_vm0, %v1845_v55 }
 0x6d1   :  { %v1857_v58 = vld [vmem:[#allocation2 + $0x8] sm:$0xff] }
 0x6d2   :  { %v1885_v59 = vadd.f32 %v1884_v45, %v1857_v58 }
 0x6d4   :  { %v1892_v32 = vadd.f32 %v3060_v29, %v1885_v59 }
 0x6d6   :  { %v1894_v38 = vmax.f32 %v1892_v32, 0.0 }
 0x6d8   :  { %2083 = vmatmul.msk.f32.gmra.mxu2 %vm224_vm3, %v1894_v38 }
 0x75b   :  { %v1929_v29 = vpop.f32.mrf.mxu2 }
 0x75c   :  { %v1930_v62 = vadd.f32 %v2095_v50, %v1929_v29 }
 0x75e   :  { %1934 = vst.msk [vmem:[%s3113_s19 + $0x8] sm:$0xff] %vm1932_vm2, %v1930_v62 }
 0x75f   :  { %2292 = dma.done.wait [#allocation5], 32  }
 0x760   :  { %2293 = vsyncadd [#allocation5], 4294967264 }
 0x761   :  { %2294 = dma.done.wait [#allocation7], 32  }
 0x762   :  { %2295 = vsyncadd [#allocation7], 4294967264 }
 0x763   :  { %1969 = vsyncpa [#allocation5], 1 }
 0x764   :  { %1970 = vsyncpa [#allocation7], 1 }

</bundles_post_ra>
